<compile_context>
chip_gen: v6e
topology: v6e:2x2x1
jax: 0.10.0
libtpu: 0.0.40
codegen_flags: <defaults>
</compile_context>

<pallas_src>
import functools

import numpy as np
import jax
import jax.numpy as jnp
from jax import lax
from jax.experimental import pallas as pl
from jax.experimental.pallas import tpu as pltpu


_TIME_BLOCK = 8    # U: timesteps per grid step (unrolled inner loop)
_BATCH_BLOCK = 8   # BB: descriptions per batch block (f32 sublane count)


# ----------------------------------------------------------------------------
# LSTM cell: gates_in already holds x @ W_ih + b (hoisted input projection).
# ----------------------------------------------------------------------------
def _lstm_cell(gates_in, h_ref, c_ref, whh_ref, mask, hidden):
    H = hidden
    gates = gates_in + jnp.dot(h_ref[...], whh_ref[...],
                               preferred_element_type=jnp.float32)
    # Full-width activations on the lane-dense (B, 4H) vreg (EUP has its own
    # issue slot), then static lane slices in PyTorch i,f,g,o order.
    sig = jax.nn.sigmoid(gates)
    th = jnp.tanh(gates)
    i = sig[:, 0 * H:1 * H]
    f = sig[:, 1 * H:2 * H]
    g = th[:, 2 * H:3 * H]
    o = sig[:, 3 * H:4 * H]
    c_new = f * c_ref[...] + i * g
    h_new = o * jnp.tanh(c_new)
    # Packed-sequence semantics: state holds across padded steps.
    c_ref[...] = jnp.where(mask, c_new, c_ref[...])
    h_ref[...] = jnp.where(mask, h_new, h_ref[...])
    return h_new


# ----------------------------------------------------------------------------
# Kernel A: per-token outputs (summarize=False path).
# One grid step = one (batch block, time block); fwd + bwd run together.
# ----------------------------------------------------------------------------
def _bilstm_tokens_kernel(len_ref, gf_ref, gb_ref, whh_f_ref, whh_b_ref,
                          out_f_ref, out_b_ref,
                          h_f, c_f, h_b, c_b, *, tblock, seq_len, hidden):
    tb = pl.program_id(1)

    @pl.when(tb == 0)
    def _():
        h_f[...] = jnp.zeros_like(h_f)
        c_f[...] = jnp.zeros_like(c_f)
        h_b[...] = jnp.zeros_like(h_b)
        c_b[...] = jnp.zeros_like(c_b)

    lengths = len_ref[...]                       # (BB, 1) int32
    t0 = tb * tblock

    def step(u, carry):
        t = t0 + u                               # forward original time index
        j = seq_len - 1 - t                      # backward original time index
        mf = lengths > t
        hf = _lstm_cell(gf_ref[u], h_f, c_f, whh_f_ref, mf, hidden)
        out_f_ref[u] = jnp.where(mf, hf, 0.0).astype(out_f_ref.dtype)
        mb = lengths > j
        hb = _lstm_cell(gb_ref[tblock - 1 - u], h_b, c_b, whh_b_ref, mb, hidden)
        out_b_ref[tblock - 1 - u] = jnp.where(mb, hb, 0.0).astype(out_b_ref.dtype)
        return carry

    lax.fori_loop(0, tblock, step, 0, unroll=True)


# ----------------------------------------------------------------------------
# Kernel B: summary-only outputs (summarize=True path) — single (BB, 2H)
# resident output written once at the last time block.
# ----------------------------------------------------------------------------
def _bilstm_summary_kernel(len_ref, gf_ref, gb_ref, whh_f_ref, whh_b_ref,
                           sum_ref,
                           h_f, c_f, h_b, c_b, *, tblock, seq_len, hidden):
    tb = pl.program_id(1)

    @pl.when(tb == 0)
    def _():
        h_f[...] = jnp.zeros_like(h_f)
        c_f[...] = jnp.zeros_like(c_f)
        h_b[...] = jnp.zeros_like(h_b)
        c_b[...] = jnp.zeros_like(c_b)

    lengths = len_ref[...]
    t0 = tb * tblock

    def step(u, carry):
        t = t0 + u
        j = seq_len - 1 - t
        _lstm_cell(gf_ref[u], h_f, c_f, whh_f_ref, lengths > t, hidden)
        _lstm_cell(gb_ref[tblock - 1 - u], h_b, c_b, whh_b_ref,
                   lengths > j, hidden)
        return carry

    lax.fori_loop(0, tblock, step, 0, unroll=True)

    @pl.when(tb == pl.num_programs(1) - 1)
    def _():
        sum_ref[...] = jnp.concatenate(
            [h_f[...], h_b[...]], axis=-1).astype(sum_ref.dtype)


# ----------------------------------------------------------------------------
# pallas_call wrapper over a padded description batch.
# ----------------------------------------------------------------------------
def bilstm_core(x_padded, lengths, params, *, summarize,
                stream_dtype=jnp.float32):
    """x_padded: (T0, B0, D) f32, lengths: (B0,) int32.
    Returns (B0, 2H) summaries if summarize else per-token (T0, B0, 2H)."""
    T0, B0, D = x_padded.shape
    H = params["whh_f"].shape[0]
    dtype = x_padded.dtype

    U, BB = _TIME_BLOCK, _BATCH_BLOCK
    T = ((T0 + U - 1) // U) * U
    B = ((B0 + BB - 1) // BB) * BB
    nT, nB = T // U, B // BB

    # Pad to kernel-friendly (bucketed) shapes; padding masked via lengths.
    x_p = jnp.pad(x_padded, ((0, T - T0), (0, B - B0), (0, 0)))
    len_p = jnp.pad(lengths.astype(jnp.int32), (0, B - B0)).reshape(B, 1)

    # Hoisted input projection: one big, MXU-friendly GEMM per direction.
    # (stream_dtype could be bf16 on v6e/v7x to halve DMA bytes; f32 here.)
    x2d = x_p.reshape(T * B, D)
    hi = jax.lax.Precision.HIGHEST
    gates_f = (jnp.dot(x2d, params["wih_f"], precision=hi)
               + params["b_f"]).reshape(T, B, 4 * H).astype(stream_dtype)
    gates_b = (jnp.dot(x2d, params["wih_b"], precision=hi)
               + params["b_b"]).reshape(T, B, 4 * H).astype(stream_dtype)
    whh_f = params["whh_f"].astype(stream_dtype)
    whh_b = params["whh_b"].astype(stream_dtype)

    len_map = lambda bb, tb: (bb, 0)
    gf_map = lambda bb, tb: (tb, bb, 0)
    gb_map = lambda bb, tb: (nT - 1 - tb, bb, 0)      # reversed time blocks
    w_map = lambda bb, tb: (0, 0)                     # resident weights

    in_specs = [
        pl.BlockSpec((BB, 1), len_map),               # lengths
        pl.BlockSpec((U, BB, 4 * H), gf_map),         # precomputed fwd gates
        pl.BlockSpec((U, BB, 4 * H), gb_map),         # precomputed bwd gates
        pl.BlockSpec((H, 4 * H), w_map),              # W_hh fwd
        pl.BlockSpec((H, 4 * H), w_map),              # W_hh bwd
    ]
    scratch = [pltpu.VMEM((BB, H), jnp.float32)] * 4  # h_f c_f h_b c_b
    grid = (nB, nT)
    # Batch blocks independent -> "parallel" (2nd TC on v7x); time is a
    # recurrence -> "arbitrary".
    dims = ("parallel", "arbitrary")

    rec_flops = 2 * T * B * (2 * H * 4 * H + 12 * H)
    rec_trans = 2 * T * B * 5 * H
    rec_bytes = 4 * (2 * T * B * 4 * H + 2 * H * 4 * H + B) \
        + (0 if summarize else 4 * 2 * T * B * H)
    cost = pl.CostEstimate(flops=rec_flops, transcendentals=rec_trans,
                           bytes_accessed=rec_bytes)

    if summarize:
        kernel = functools.partial(_bilstm_summary_kernel,
                                   tblock=U, seq_len=T, hidden=H)
        h_summary = pl.pallas_call(
            kernel,
            out_shape=jax.ShapeDtypeStruct((B, 2 * H), dtype),
            grid=grid,
            in_specs=in_specs,
            out_specs=pl.BlockSpec((BB, 2 * H), lambda bb, tb: (bb, 0)),
            scratch_shapes=scratch,
            compiler_params=pltpu.CompilerParams(dimension_semantics=dims),
            cost_estimate=cost,
        )(len_p, gates_f, gates_b, whh_f, whh_b)
        return h_summary[:B0]                                     # (B0, 2H)

    kernel = functools.partial(_bilstm_tokens_kernel,
                               tblock=U, seq_len=T, hidden=H)
    out_f, out_b = pl.pallas_call(
        kernel,
        out_shape=(jax.ShapeDtypeStruct((T, B, H), dtype),
                   jax.ShapeDtypeStruct((T, B, H), dtype)),
        grid=grid,
        in_specs=in_specs,
        out_specs=(pl.BlockSpec((U, BB, H), gf_map),
                   pl.BlockSpec((U, BB, H), gb_map)),
        scratch_shapes=scratch,
        compiler_params=pltpu.CompilerParams(dimension_semantics=dims),
        cost_estimate=cost,
    )(len_p, gates_f, gates_b, whh_f, whh_b)

    out = jnp.concatenate([out_f, out_b], axis=-1)[:T0, :B0]      # (T0,B0,2H)
    return out


# ----------------------------------------------------------------------------
# Module-level forward (mirrors BiLSTM.forward, native path, eval dropout).
# ----------------------------------------------------------------------------
def bilstm_forward(all_embs, boundaries, params, summarize=True):
    """all_embs: list of (S_b, D) arrays (stand-in for PackedSequencePlus);
    boundaries: per-batch-item boundary index lists.
    Returns (new_all_embs, new_boundaries)."""
    # ---- host-side re-packing: one padded column per description ----
    np_embs = [np.asarray(e) for e in all_embs]
    desc_meta, desc_lengths = [], []
    for b_idx, bnds in enumerate(boundaries):
        for d_idx, (l, r) in enumerate(zip(bnds, bnds[1:])):
            desc_meta.append((b_idx, d_idx, l, r))
            desc_lengths.append(r - l)
    n_desc = len(desc_meta)
    if n_desc == 0:
        # TODO(synk): empty description list (PyTorch packed sequences error).
        raise ValueError("BiLSTM: no descriptions to process")
    # TODO(synk): zero-length descriptions yield zero vectors here; PyTorch's
    # packed sequences would reject them.
    D = np_embs[0].shape[-1]
    T0 = max(max(desc_lengths), 1)

    x_np = np.zeros((T0, n_desc, D), dtype=np_embs[0].dtype)
    for k, (b_idx, _d, l, r) in enumerate(desc_meta):
        if r > l:
            x_np[: r - l, k, :] = np_embs[b_idx][l:r]
    x_padded = jnp.asarray(x_np)
    lengths = jnp.asarray(desc_lengths, dtype=jnp.int32)

    # TODO(synk): nn.Dropout is identity in eval mode; training-mode stochastic
    # dropout of x_padded is not implemented here.

    if summarize:
        h_summary = bilstm_core(x_padded, lengths, params, summarize=True)
        new_all_embs, k = [], 0
        for bnds in boundaries:
            nd = len(bnds) - 1
            new_all_embs.append(h_summary[k:k + nd])
            k += nd
        new_boundaries = [list(range(len(bnds))) for bnds in boundaries]
        return new_all_embs, new_boundaries
    else:
        out = bilstm_core(x_padded, lengths, params, summarize=False)
        out_np = np.asarray(out)            # single device->host fetch
        H2 = out_np.shape[-1]
        new_np = [np.zeros((e.shape[0], H2), out_np.dtype) for e in np_embs]
        for k, (b_idx, _d, l, r) in enumerate(desc_meta):
            if r > l:
                new_np[b_idx][l:r] = out_np[: r - l, k, :]
        return [jnp.asarray(a) for a in new_np], boundaries


# ----------------------------------------------------------------------------
# Pure-JAX reference (per-description, exact packed semantics).
# ----------------------------------------------------------------------------
def _ref_lstm_dir(xs, wih, whh, b):
    H = whh.shape[0]
    h = jnp.zeros((H,), jnp.float32)
    c = jnp.zeros((H,), jnp.float32)
    hs = []
    for x in xs:
        gates = x @ wih + h @ whh + b[0]
        i = jax.nn.sigmoid(gates[0 * H:1 * H])
        f = jax.nn.sigmoid(gates[1 * H:2 * H])
        g = jnp.tanh(gates[2 * H:3 * H])
        o = jax.nn.sigmoid(gates[3 * H:4 * H])
        c = f * c + i * g
        h = o * jnp.tanh(c)
        hs.append(h)
    return hs, h


def ref_bilstm_single(x_seq, params):
    xs = [x_seq[i] for i in range(x_seq.shape[0])]
    hs_f, hf = _ref_lstm_dir(xs, params["wih_f"], params["whh_f"], params["b_f"])
    hs_b, hb = _ref_lstm_dir(xs[::-1], params["wih_b"], params["whh_b"],
                             params["b_b"])
    hs_b = hs_b[::-1]
    out = jnp.stack([jnp.concatenate([a, r]) for a, r in zip(hs_f, hs_b)])
    return out, jnp.concatenate([hf, hb])


if __name__ == "__main__":
    key = jax.random.PRNGKey(0)
    D = 32                 # input_size
    OUT = 64               # output_size
    H = OUT // 2           # hidden per direction
    boundaries = [[0, 3, 7, 12], [0, 4, 9]]
    seq_lens = [12, 9]

    keys = jax.random.split(key, 8)
    all_embs = [
        0.5 * jax.random.normal(keys[0], (seq_lens[0], D), jnp.float32),
        0.5 * jax.random.normal(keys[1], (seq_lens[1], D), jnp.float32),
    ]
    w = lambda k, shape: 0.2 * jax.random.normal(k, shape, jnp.float32)
    params = {
        "wih_f": w(keys[2], (D, 4 * H)),
        "whh_f": w(keys[3], (H, 4 * H)),
        "b_f":   w(keys[4], (1, 4 * H)),
        "wih_b": w(keys[5], (D, 4 * H)),
        "whh_b": w(keys[6], (H, 4 * H)),
        "b_b":   w(keys[7], (1, 4 * H)),
    }

    # summarize=True path (per-description summary vectors, summary-only kernel).
    sum_embs, sum_bnds = bilstm_forward(all_embs, boundaries, params,
                                        summarize=True)
    sum_embs = jax.block_until_ready(sum_embs)

    # summarize=False path (per-token bidirectional outputs).
    tok_embs, tok_bnds = bilstm_forward(all_embs, boundaries, params,
                                        summarize=False)
    tok_embs = jax.block_until_ready(tok_embs)

    # ---- reference check against a plain-JAX per-description BiLSTM ----
    ok = True
    for b_idx, bnds in enumerate(boundaries):
        for d_idx, (l, r) in enumerate(zip(bnds, bnds[1:])):
            o_ref, s_ref = ref_bilstm_single(all_embs[b_idx][l:r], params)
            ok &= bool(jnp.allclose(sum_embs[b_idx][d_idx], s_ref,
                                    atol=1e-4, rtol=1e-4))
            ok &= bool(jnp.allclose(tok_embs[b_idx][l:r], o_ref,
                                    atol=1e-4, rtol=1e-4))
    assert ok, "Pallas BiLSTM mismatch vs reference"
    assert sum_bnds == [[0, 1, 2, 3], [0, 1, 2]]
    assert tok_bnds == boundaries

    print("KERNEL_OK")
</pallas_src>

<mosaic_0001>
module attributes {stable_mosaic.version = 11 : i64} {
  func.func @_bilstm_summary_kernel(%arg0: i32, %arg1: i32, %arg2: memref<8x1xi32, #tpu.memory_space<vmem>>, %arg3: memref<8x8x128xf32, #tpu.memory_space<vmem>>, %arg4: memref<8x8x128xf32, #tpu.memory_space<vmem>>, %arg5: memref<32x128xf32, #tpu.memory_space<vmem>>, %arg6: memref<32x128xf32, #tpu.memory_space<vmem>>, %arg7: memref<8x64xf32, #tpu.memory_space<vmem>>, %arg8: memref<8x32xf32, #tpu.memory_space<vmem>>, %arg9: memref<8x32xf32, #tpu.memory_space<vmem>>, %arg10: memref<8x32xf32, #tpu.memory_space<vmem>>, %arg11: memref<8x32xf32, #tpu.memory_space<vmem>>) attributes {dimension_semantics = [#tpu.dimension_semantics<parallel>, #tpu.dimension_semantics<arbitrary>], iteration_bounds = array<i64: 1, 1>, scalar_prefetch = 0 : i64, scratch_operands = 4 : i64, tpu.core_type = #tpu.core_type<tc>, window_params = [{transform_indices = @transform_0, window_bounds = array<i64: 8, 1>}, {transform_indices = @transform_1, window_bounds = array<i64: 8, 8, 128>}, {transform_indices = @transform_2, window_bounds = array<i64: 8, 8, 128>}, {pipeline_mode = #tpu.pipeline_mode<synchronous>, transform_indices = @transform_3, window_bounds = array<i64: 32, 128>}, {pipeline_mode = #tpu.pipeline_mode<synchronous>, transform_indices = @transform_4, window_bounds = array<i64: 32, 128>}, {transform_indices = @transform_5, window_bounds = array<i64: 8, 64>}]} {
    %c0_i32 = arith.constant 0 : i32
    %0 = arith.cmpi eq, %arg1, %c0_i32 : i32
    %1 = arith.extui %0 : i1 to i32
    %c0_i32_0 = arith.constant 0 : i32
    %2 = arith.cmpi ne, %1, %c0_i32_0 : i32
    scf.if %2 {
      %cst_309 = arith.constant 0.000000e+00 : f32
      %592 = vector.broadcast %cst_309 : f32 to vector<8x32xf32>
      %c0_310 = arith.constant 0 : index
      %c0_311 = arith.constant 0 : index
      %593 = vector.load %arg8[%c0_310, %c0_311] : memref<8x32xf32, #tpu.memory_space<vmem>>, vector<8x32xf32>
      tpu.vector_store %arg8[%c0_310, %c0_311], %592 {strides = array<i32>} : memref<8x32xf32, #tpu.memory_space<vmem>>, vector<8x32xf32>,
      %cst_312 = arith.constant 0.000000e+00 : f32
      %594 = vector.broadcast %cst_312 : f32 to vector<8x32xf32>
      %c0_313 = arith.constant 0 : index
      %c0_314 = arith.constant 0 : index
      %595 = vector.load %arg9[%c0_313, %c0_314] : memref<8x32xf32, #tpu.memory_space<vmem>>, vector<8x32xf32>
      tpu.vector_store %arg9[%c0_313, %c0_314], %594 {strides = array<i32>} : memref<8x32xf32, #tpu.memory_space<vmem>>, vector<8x32xf32>,
      %cst_315 = arith.constant 0.000000e+00 : f32
      %596 = vector.broadcast %cst_315 : f32 to vector<8x32xf32>
      %c0_316 = arith.constant 0 : index
      %c0_317 = arith.constant 0 : index
      %597 = vector.load %arg10[%c0_316, %c0_317] : memref<8x32xf32, #tpu.memory_space<vmem>>, vector<8x32xf32>
      tpu.vector_store %arg10[%c0_316, %c0_317], %596 {strides = array<i32>} : memref<8x32xf32, #tpu.memory_space<vmem>>, vector<8x32xf32>,
      %cst_318 = arith.constant 0.000000e+00 : f32
      %598 = vector.broadcast %cst_318 : f32 to vector<8x32xf32>
      %c0_319 = arith.constant 0 : index
      %c0_320 = arith.constant 0 : index
      %599 = vector.load %arg11[%c0_319, %c0_320] : memref<8x32xf32, #tpu.memory_space<vmem>>, vector<8x32xf32>
      tpu.vector_store %arg11[%c0_319, %c0_320], %598 {strides = array<i32>} : memref<8x32xf32, #tpu.memory_space<vmem>>, vector<8x32xf32>,
    } else {
    }
    %c0 = arith.constant 0 : index
    %c0_1 = arith.constant 0 : index
    %3 = vector.load %arg2[%c0, %c0_1] : memref<8x1xi32, #tpu.memory_space<vmem>>, vector<8x1xi32>
    %c8_i32 = arith.constant 8 : i32
    %4 = arith.muli %arg1, %c8_i32 : i32
    %c0_i32_2 = arith.constant 0 : i32
    %5 = arith.addi %4, %c0_i32_2 : i32
    %c7_i32 = arith.constant 7 : i32
    %6 = arith.subi %c7_i32, %5 : i32
    %7 = arith.index_cast %c0_i32_2 : i32 to index
    %c0_3 = arith.constant 0 : index
    %c0_4 = arith.constant 0 : index
    %8 = vector.load %arg3[%7, %c0_3, %c0_4] : memref<8x8x128xf32, #tpu.memory_space<vmem>>, vector<1x8x128xf32>
    %9 = vector.shape_cast %8 : vector<1x8x128xf32> to vector<8x128xf32>
    %10 = vector.broadcast %5 : i32 to vector<8x1xi32>
    %11 = arith.cmpi sgt, %3, %10 : vector<8x1xi32>
    %c0_5 = arith.constant 0 : index
    %c0_6 = arith.constant 0 : index
    %12 = vector.load %arg8[%c0_5, %c0_6] : memref<8x32xf32, #tpu.memory_space<vmem>>, vector<8x32xf32>
    %c0_7 = arith.constant 0 : index
    %c0_8 = arith.constant 0 : index
    %13 = vector.load %arg5[%c0_7, %c0_8] : memref<32x128xf32, #tpu.memory_space<vmem>>, vector<32x128xf32>
    %cst = arith.constant dense<0.000000e+00> : vector<8x128xf32>
    %14 = tpu.matmul %12, %13, %cst {dimension_numbers = #tpu.dot_dimension_numbers<[1], [0], [0], [1], [0, 0, 1, 1], [], []>} : vector<8x32xf32>, vector<32x128xf32>, vector<8x128xf32> -> vector<8x128xf32>
    %15 = arith.addf %9, %14 : vector<8x128xf32>
    %16 = arith.negf %15 : vector<8x128xf32>
    %17 = math.exp %16 : vector<8x128xf32>
    %cst_9 = arith.constant 1.000000e+00 : f32
    %18 = vector.broadcast %cst_9 : f32 to vector<8x128xf32>
    %19 = arith.addf %18, %17 : vector<8x128xf32>
    %20 = arith.divf %18, %19 : vector<8x128xf32>
    %21 = math.tanh %15 : vector<8x128xf32>
    %22 = vector.extract_strided_slice %20 {offsets = [0, 0], sizes = [8, 32], strides = [1, 1]} : vector<8x128xf32> to vector<8x32xf32>
    %23 = vector.extract_strided_slice %20 {offsets = [0, 32], sizes = [8, 32], strides = [1, 1]} : vector<8x128xf32> to vector<8x32xf32>
    %24 = vector.extract_strided_slice %21 {offsets = [0, 64], sizes = [8, 32], strides = [1, 1]} : vector<8x128xf32> to vector<8x32xf32>
    %25 = vector.extract_strided_slice %20 {offsets = [0, 96], sizes = [8, 32], strides = [1, 1]} : vector<8x128xf32> to vector<8x32xf32>
    %c0_10 = arith.constant 0 : index
    %c0_11 = arith.constant 0 : index
    %26 = vector.load %arg9[%c0_10, %c0_11] : memref<8x32xf32, #tpu.memory_space<vmem>>, vector<8x32xf32>
    %27 = arith.mulf %23, %26 : vector<8x32xf32>
    %28 = arith.mulf %22, %24 : vector<8x32xf32>
    %29 = arith.addf %27, %28 : vector<8x32xf32>
    %30 = math.tanh %29 : vector<8x32xf32>
    %31 = arith.mulf %25, %30 : vector<8x32xf32>
    %c0_12 = arith.constant 0 : index
    %c0_13 = arith.constant 0 : index
    %32 = vector.load %arg9[%c0_12, %c0_13] : memref<8x32xf32, #tpu.memory_space<vmem>>, vector<8x32xf32>
    %33 = vector.shape_cast %11 : vector<8x1xi1> to vector<8x1xi1>
    %34 = vector.broadcast %33 : vector<8x1xi1> to vector<8x32xi1>
    %35 = arith.select %34, %29, %32 : vector<8x32xi1>, vector<8x32xf32>
    %c0_14 = arith.constant 0 : index
    %c0_15 = arith.constant 0 : index
    %36 = vector.load %arg9[%c0_14, %c0_15] : memref<8x32xf32, #tpu.memory_space<vmem>>, vector<8x32xf32>
    tpu.vector_store %arg9[%c0_14, %c0_15], %35 {strides = array<i32>} : memref<8x32xf32, #tpu.memory_space<vmem>>, vector<8x32xf32>,
    %c0_16 = arith.constant 0 : index
    %c0_17 = arith.constant 0 : index
    %37 = vector.load %arg8[%c0_16, %c0_17] : memref<8x32xf32, #tpu.memory_space<vmem>>, vector<8x32xf32>
    %38 = vector.shape_cast %11 : vector<8x1xi1> to vector<8x1xi1>
    %39 = vector.broadcast %38 : vector<8x1xi1> to vector<8x32xi1>
    %40 = arith.select %39, %31, %37 : vector<8x32xi1>, vector<8x32xf32>
    %c0_18 = arith.constant 0 : index
    %c0_19 = arith.constant 0 : index
    %41 = vector.load %arg8[%c0_18, %c0_19] : memref<8x32xf32, #tpu.memory_space<vmem>>, vector<8x32xf32>
    tpu.vector_store %arg8[%c0_18, %c0_19], %40 {strides = array<i32>} : memref<8x32xf32, #tpu.memory_space<vmem>>, vector<8x32xf32>,
    %c7_i32_20 = arith.constant 7 : i32
    %42 = arith.subi %c7_i32_20, %c0_i32_2 : i32
    %43 = arith.index_cast %42 : i32 to index
    %c0_21 = arith.constant 0 : index
    %c0_22 = arith.constant 0 : index
    %44 = vector.load %arg4[%43, %c0_21, %c0_22] : memref<8x8x128xf32, #tpu.memory_space<vmem>>, vector<1x8x128xf32>
    %45 = vector.shape_cast %44 : vector<1x8x128xf32> to vector<8x128xf32>
    %46 = vector.broadcast %6 : i32 to vector<8x1xi32>
    %47 = arith.cmpi sgt, %3, %46 : vector<8x1xi32>
    %c0_23 = arith.constant 0 : index
    %c0_24 = arith.constant 0 : index
    %48 = vector.load %arg10[%c0_23, %c0_24] : memref<8x32xf32, #tpu.memory_space<vmem>>, vector<8x32xf32>
    %c0_25 = arith.constant 0 : index
    %c0_26 = arith.constant 0 : index
    %49 = vector.load %arg6[%c0_25, %c0_26] : memref<32x128xf32, #tpu.memory_space<vmem>>, vector<32x128xf32>
    %cst_27 = arith.constant dense<0.000000e+00> : vector<8x128xf32>
    %50 = tpu.matmul %48, %49, %cst_27 {dimension_numbers = #tpu.dot_dimension_numbers<[1], [0], [0], [1], [0, 0, 1, 1], [], []>} : vector<8x32xf32>, vector<32x128xf32>, vector<8x128xf32> -> vector<8x128xf32>
    %51 = arith.addf %45, %50 : vector<8x128xf32>
    %52 = arith.negf %51 : vector<8x128xf32>
    %53 = math.exp %52 : vector<8x128xf32>
    %cst_28 = arith.constant 1.000000e+00 : f32
    %54 = vector.broadcast %cst_28 : f32 to vector<8x128xf32>
    %55 = arith.addf %54, %53 : vector<8x128xf32>
    %56 = arith.divf %54, %55 : vector<8x128xf32>
    %57 = math.tanh %51 : vector<8x128xf32>
    %58 = vector.extract_strided_slice %56 {offsets = [0, 0], sizes = [8, 32], strides = [1, 1]} : vector<8x128xf32> to vector<8x32xf32>
    %59 = vector.extract_strided_slice %56 {offsets = [0, 32], sizes = [8, 32], strides = [1, 1]} : vector<8x128xf32> to vector<8x32xf32>
    %60 = vector.extract_strided_slice %57 {offsets = [0, 64], sizes = [8, 32], strides = [1, 1]} : vector<8x128xf32> to vector<8x32xf32>
    %61 = vector.extract_strided_slice %56 {offsets = [0, 96], sizes = [8, 32], strides = [1, 1]} : vector<8x128xf32> to vector<8x32xf32>
    %c0_29 = arith.constant 0 : index
    %c0_30 = arith.constant 0 : index
    %62 = vector.load %arg11[%c0_29, %c0_30] : memref<8x32xf32, #tpu.memory_space<vmem>>, vector<8x32xf32>
    %63 = arith.mulf %59, %62 : vector<8x32xf32>
    %64 = arith.mulf %58, %60 : vector<8x32xf32>
    %65 = arith.addf %63, %64 : vector<8x32xf32>
    %66 = math.tanh %65 : vector<8x32xf32>
    %67 = arith.mulf %61, %66 : vector<8x32xf32>
    %c0_31 = arith.constant 0 : index
    %c0_32 = arith.constant 0 : index
    %68 = vector.load %arg11[%c0_31, %c0_32] : memref<8x32xf32, #tpu.memory_space<vmem>>, vector<8x32xf32>
    %69 = vector.shape_cast %47 : vector<8x1xi1> to vector<8x1xi1>
    %70 = vector.broadcast %69 : vector<8x1xi1> to vector<8x32xi1>
    %71 = arith.select %70, %65, %68 : vector<8x32xi1>, vector<8x32xf32>
    %c0_33 = arith.constant 0 : index
    %c0_34 = arith.constant 0 : index
    %72 = vector.load %arg11[%c0_33, %c0_34] : memref<8x32xf32, #tpu.memory_space<vmem>>, vector<8x32xf32>
    tpu.vector_store %arg11[%c0_33, %c0_34], %71 {strides = array<i32>} : memref<8x32xf32, #tpu.memory_space<vmem>>, vector<8x32xf32>,
    %c0_35 = arith.constant 0 : index
    %c0_36 = arith.constant 0 : index
    %73 = vector.load %arg10[%c0_35, %c0_36] : memref<8x32xf32, #tpu.memory_space<vmem>>, vector<8x32xf32>
    %74 = vector.shape_cast %47 : vector<8x1xi1> to vector<8x1xi1>
    %75 = vector.broadcast %74 : vector<8x1xi1> to vector<8x32xi1>
    %76 = arith.select %75, %67, %73 : vector<8x32xi1>, vector<8x32xf32>
    %c0_37 = arith.constant 0 : index
    %c0_38 = arith.constant 0 : index
    %77 = vector.load %arg10[%c0_37, %c0_38] : memref<8x32xf32, #tpu.memory_space<vmem>>, vector<8x32xf32>
    tpu.vector_store %arg10[%c0_37, %c0_38], %76 {strides = array<i32>} : memref<8x32xf32, #tpu.memory_space<vmem>>, vector<8x32xf32>,
    %c1_i32 = arith.constant 1 : i32
    %78 = arith.addi %4, %c1_i32 : i32
    %c7_i32_39 = arith.constant 7 : i32
    %79 = arith.subi %c7_i32_39, %78 : i32
    %80 = arith.index_cast %c1_i32 : i32 to index
    %c0_40 = arith.constant 0 : index
    %c0_41 = arith.constant 0 : index
    %81 = vector.load %arg3[%80, %c0_40, %c0_41] : memref<8x8x128xf32, #tpu.memory_space<vmem>>, vector<1x8x128xf32>
    %82 = vector.shape_cast %81 : vector<1x8x128xf32> to vector<8x128xf32>
    %83 = vector.broadcast %78 : i32 to vector<8x1xi32>
    %84 = arith.cmpi sgt, %3, %83 : vector<8x1xi32>
    %c0_42 = arith.constant 0 : index
    %c0_43 = arith.constant 0 : index
    %85 = vector.load %arg8[%c0_42, %c0_43] : memref<8x32xf32, #tpu.memory_space<vmem>>, vector<8x32xf32>
    %c0_44 = arith.constant 0 : index
    %c0_45 = arith.constant 0 : index
    %86 = vector.load %arg5[%c0_44, %c0_45] : memref<32x128xf32, #tpu.memory_space<vmem>>, vector<32x128xf32>
    %cst_46 = arith.constant dense<0.000000e+00> : vector<8x128xf32>
    %87 = tpu.matmul %85, %86, %cst_46 {dimension_numbers = #tpu.dot_dimension_numbers<[1], [0], [0], [1], [0, 0, 1, 1], [], []>} : vector<8x32xf32>, vector<32x128xf32>, vector<8x128xf32> -> vector<8x128xf32>
    %88 = arith.addf %82, %87 : vector<8x128xf32>
    %89 = arith.negf %88 : vector<8x128xf32>
    %90 = math.exp %89 : vector<8x128xf32>
    %cst_47 = arith.constant 1.000000e+00 : f32
    %91 = vector.broadcast %cst_47 : f32 to vector<8x128xf32>
    %92 = arith.addf %91, %90 : vector<8x128xf32>
    %93 = arith.divf %91, %92 : vector<8x128xf32>
    %94 = math.tanh %88 : vector<8x128xf32>
    %95 = vector.extract_strided_slice %93 {offsets = [0, 0], sizes = [8, 32], strides = [1, 1]} : vector<8x128xf32> to vector<8x32xf32>
    %96 = vector.extract_strided_slice %93 {offsets = [0, 32], sizes = [8, 32], strides = [1, 1]} : vector<8x128xf32> to vector<8x32xf32>
    %97 = vector.extract_strided_slice %94 {offsets = [0, 64], sizes = [8, 32], strides = [1, 1]} : vector<8x128xf32> to vector<8x32xf32>
    %98 = vector.extract_strided_slice %93 {offsets = [0, 96], sizes = [8, 32], strides = [1, 1]} : vector<8x128xf32> to vector<8x32xf32>
    %c0_48 = arith.constant 0 : index
    %c0_49 = arith.constant 0 : index
    %99 = vector.load %arg9[%c0_48, %c0_49] : memref<8x32xf32, #tpu.memory_space<vmem>>, vector<8x32xf32>
    %100 = arith.mulf %96, %99 : vector<8x32xf32>
    %101 = arith.mulf %95, %97 : vector<8x32xf32>
    %102 = arith.addf %100, %101 : vector<8x32xf32>
    %103 = math.tanh %102 : vector<8x32xf32>
    %104 = arith.mulf %98, %103 : vector<8x32xf32>
    %c0_50 = arith.constant 0 : index
    %c0_51 = arith.constant 0 : index
    %105 = vector.load %arg9[%c0_50, %c0_51] : memref<8x32xf32, #tpu.memory_space<vmem>>, vector<8x32xf32>
    %106 = vector.shape_cast %84 : vector<8x1xi1> to vector<8x1xi1>
    %107 = vector.broadcast %106 : vector<8x1xi1> to vector<8x32xi1>
    %108 = arith.select %107, %102, %105 : vector<8x32xi1>, vector<8x32xf32>
    %c0_52 = arith.constant 0 : index
    %c0_53 = arith.constant 0 : index
    %109 = vector.load %arg9[%c0_52, %c0_53] : memref<8x32xf32, #tpu.memory_space<vmem>>, vector<8x32xf32>
    tpu.vector_store %arg9[%c0_52, %c0_53], %108 {strides = array<i32>} : memref<8x32xf32, #tpu.memory_space<vmem>>, vector<8x32xf32>,
    %c0_54 = arith.constant 0 : index
    %c0_55 = arith.constant 0 : index
    %110 = vector.load %arg8[%c0_54, %c0_55] : memref<8x32xf32, #tpu.memory_space<vmem>>, vector<8x32xf32>
    %111 = vector.shape_cast %84 : vector<8x1xi1> to vector<8x1xi1>
    %112 = vector.broadcast %111 : vector<8x1xi1> to vector<8x32xi1>
    %113 = arith.select %112, %104, %110 : vector<8x32xi1>, vector<8x32xf32>
    %c0_56 = arith.constant 0 : index
    %c0_57 = arith.constant 0 : index
    %114 = vector.load %arg8[%c0_56, %c0_57] : memref<8x32xf32, #tpu.memory_space<vmem>>, vector<8x32xf32>
    tpu.vector_store %arg8[%c0_56, %c0_57], %113 {strides = array<i32>} : memref<8x32xf32, #tpu.memory_space<vmem>>, vector<8x32xf32>,
    %c7_i32_58 = arith.constant 7 : i32
    %115 = arith.subi %c7_i32_58, %c1_i32 : i32
    %116 = arith.index_cast %115 : i32 to index
    %c0_59 = arith.constant 0 : index
    %c0_60 = arith.constant 0 : index
    %117 = vector.load %arg4[%116, %c0_59, %c0_60] : memref<8x8x128xf32, #tpu.memory_space<vmem>>, vector<1x8x128xf32>
    %118 = vector.shape_cast %117 : vector<1x8x128xf32> to vector<8x128xf32>
    %119 = vector.broadcast %79 : i32 to vector<8x1xi32>
    %120 = arith.cmpi sgt, %3, %119 : vector<8x1xi32>
    %c0_61 = arith.constant 0 : index
    %c0_62 = arith.constant 0 : index
    %121 = vector.load %arg10[%c0_61, %c0_62] : memref<8x32xf32, #tpu.memory_space<vmem>>, vector<8x32xf32>
    %c0_63 = arith.constant 0 : index
    %c0_64 = arith.constant 0 : index
    %122 = vector.load %arg6[%c0_63, %c0_64] : memref<32x128xf32, #tpu.memory_space<vmem>>, vector<32x128xf32>
    %cst_65 = arith.constant dense<0.000000e+00> : vector<8x128xf32>
    %123 = tpu.matmul %121, %122, %cst_65 {dimension_numbers = #tpu.dot_dimension_numbers<[1], [0], [0], [1], [0, 0, 1, 1], [], []>} : vector<8x32xf32>, vector<32x128xf32>, vector<8x128xf32> -> vector<8x128xf32>
    %124 = arith.addf %118, %123 : vector<8x128xf32>
    %125 = arith.negf %124 : vector<8x128xf32>
    %126 = math.exp %125 : vector<8x128xf32>
    %cst_66 = arith.constant 1.000000e+00 : f32
    %127 = vector.broadcast %cst_66 : f32 to vector<8x128xf32>
    %128 = arith.addf %127, %126 : vector<8x128xf32>
    %129 = arith.divf %127, %128 : vector<8x128xf32>
    %130 = math.tanh %124 : vector<8x128xf32>
    %131 = vector.extract_strided_slice %129 {offsets = [0, 0], sizes = [8, 32], strides = [1, 1]} : vector<8x128xf32> to vector<8x32xf32>
    %132 = vector.extract_strided_slice %129 {offsets = [0, 32], sizes = [8, 32], strides = [1, 1]} : vector<8x128xf32> to vector<8x32xf32>
    %133 = vector.extract_strided_slice %130 {offsets = [0, 64], sizes = [8, 32], strides = [1, 1]} : vector<8x128xf32> to vector<8x32xf32>
    %134 = vector.extract_strided_slice %129 {offsets = [0, 96], sizes = [8, 32], strides = [1, 1]} : vector<8x128xf32> to vector<8x32xf32>
    %c0_67 = arith.constant 0 : index
    %c0_68 = arith.constant 0 : index
    %135 = vector.load %arg11[%c0_67, %c0_68] : memref<8x32xf32, #tpu.memory_space<vmem>>, vector<8x32xf32>
    %136 = arith.mulf %132, %135 : vector<8x32xf32>
    %137 = arith.mulf %131, %133 : vector<8x32xf32>
    %138 = arith.addf %136, %137 : vector<8x32xf32>
    %139 = math.tanh %138 : vector<8x32xf32>
    %140 = arith.mulf %134, %139 : vector<8x32xf32>
    %c0_69 = arith.constant 0 : index
    %c0_70 = arith.constant 0 : index
    %141 = vector.load %arg11[%c0_69, %c0_70] : memref<8x32xf32, #tpu.memory_space<vmem>>, vector<8x32xf32>
    %142 = vector.shape_cast %120 : vector<8x1xi1> to vector<8x1xi1>
    %143 = vector.broadcast %142 : vector<8x1xi1> to vector<8x32xi1>
    %144 = arith.select %143, %138, %141 : vector<8x32xi1>, vector<8x32xf32>
    %c0_71 = arith.constant 0 : index
    %c0_72 = arith.constant 0 : index
    %145 = vector.load %arg11[%c0_71, %c0_72] : memref<8x32xf32, #tpu.memory_space<vmem>>, vector<8x32xf32>
    tpu.vector_store %arg11[%c0_71, %c0_72], %144 {strides = array<i32>} : memref<8x32xf32, #tpu.memory_space<vmem>>, vector<8x32xf32>,
    %c0_73 = arith.constant 0 : index
    %c0_74 = arith.constant 0 : index
    %146 = vector.load %arg10[%c0_73, %c0_74] : memref<8x32xf32, #tpu.memory_space<vmem>>, vector<8x32xf32>
    %147 = vector.shape_cast %120 : vector<8x1xi1> to vector<8x1xi1>
    %148 = vector.broadcast %147 : vector<8x1xi1> to vector<8x32xi1>
    %149 = arith.select %148, %140, %146 : vector<8x32xi1>, vector<8x32xf32>
    %c0_75 = arith.constant 0 : index
    %c0_76 = arith.constant 0 : index
    %150 = vector.load %arg10[%c0_75, %c0_76] : memref<8x32xf32, #tpu.memory_space<vmem>>, vector<8x32xf32>
    tpu.vector_store %arg10[%c0_75, %c0_76], %149 {strides = array<i32>} : memref<8x32xf32, #tpu.memory_space<vmem>>, vector<8x32xf32>,
    %c2_i32 = arith.constant 2 : i32
    %151 = arith.addi %4, %c2_i32 : i32
    %c7_i32_77 = arith.constant 7 : i32
    %152 = arith.subi %c7_i32_77, %151 : i32
    %153 = arith.index_cast %c2_i32 : i32 to index
    %c0_78 = arith.constant 0 : index
    %c0_79 = arith.constant 0 : index
    %154 = vector.load %arg3[%153, %c0_78, %c0_79] : memref<8x8x128xf32, #tpu.memory_space<vmem>>, vector<1x8x128xf32>
    %155 = vector.shape_cast %154 : vector<1x8x128xf32> to vector<8x128xf32>
    %156 = vector.broadcast %151 : i32 to vector<8x1xi32>
    %157 = arith.cmpi sgt, %3, %156 : vector<8x1xi32>
    %c0_80 = arith.constant 0 : index
    %c0_81 = arith.constant 0 : index
    %158 = vector.load %arg8[%c0_80, %c0_81] : memref<8x32xf32, #tpu.memory_space<vmem>>, vector<8x32xf32>
    %c0_82 = arith.constant 0 : index
    %c0_83 = arith.constant 0 : index
    %159 = vector.load %arg5[%c0_82, %c0_83] : memref<32x128xf32, #tpu.memory_space<vmem>>, vector<32x128xf32>
    %cst_84 = arith.constant dense<0.000000e+00> : vector<8x128xf32>
    %160 = tpu.matmul %158, %159, %cst_84 {dimension_numbers = #tpu.dot_dimension_numbers<[1], [0], [0], [1], [0, 0, 1, 1], [], []>} : vector<8x32xf32>, vector<32x128xf32>, vector<8x128xf32> -> vector<8x128xf32>
    %161 = arith.addf %155, %160 : vector<8x128xf32>
    %162 = arith.negf %161 : vector<8x128xf32>
    %163 = math.exp %162 : vector<8x128xf32>
    %cst_85 = arith.constant 1.000000e+00 : f32
    %164 = vector.broadcast %cst_85 : f32 to vector<8x128xf32>
    %165 = arith.addf %164, %163 : vector<8x128xf32>
    %166 = arith.divf %164, %165 : vector<8x128xf32>
    %167 = math.tanh %161 : vector<8x128xf32>
    %168 = vector.extract_strided_slice %166 {offsets = [0, 0], sizes = [8, 32], strides = [1, 1]} : vector<8x128xf32> to vector<8x32xf32>
    %169 = vector.extract_strided_slice %166 {offsets = [0, 32], sizes = [8, 32], strides = [1, 1]} : vector<8x128xf32> to vector<8x32xf32>
    %170 = vector.extract_strided_slice %167 {offsets = [0, 64], sizes = [8, 32], strides = [1, 1]} : vector<8x128xf32> to vector<8x32xf32>
    %171 = vector.extract_strided_slice %166 {offsets = [0, 96], sizes = [8, 32], strides = [1, 1]} : vector<8x128xf32> to vector<8x32xf32>
    %c0_86 = arith.constant 0 : index
    %c0_87 = arith.constant 0 : index
    %172 = vector.load %arg9[%c0_86, %c0_87] : memref<8x32xf32, #tpu.memory_space<vmem>>, vector<8x32xf32>
    %173 = arith.mulf %169, %172 : vector<8x32xf32>
    %174 = arith.mulf %168, %170 : vector<8x32xf32>
    %175 = arith.addf %173, %174 : vector<8x32xf32>
    %176 = math.tanh %175 : vector<8x32xf32>
    %177 = arith.mulf %171, %176 : vector<8x32xf32>
    %c0_88 = arith.constant 0 : index
    %c0_89 = arith.constant 0 : index
    %178 = vector.load %arg9[%c0_88, %c0_89] : memref<8x32xf32, #tpu.memory_space<vmem>>, vector<8x32xf32>
    %179 = vector.shape_cast %157 : vector<8x1xi1> to vector<8x1xi1>
    %180 = vector.broadcast %179 : vector<8x1xi1> to vector<8x32xi1>
    %181 = arith.select %180, %175, %178 : vector<8x32xi1>, vector<8x32xf32>
    %c0_90 = arith.constant 0 : index
    %c0_91 = arith.constant 0 : index
    %182 = vector.load %arg9[%c0_90, %c0_91] : memref<8x32xf32, #tpu.memory_space<vmem>>, vector<8x32xf32>
    tpu.vector_store %arg9[%c0_90, %c0_91], %181 {strides = array<i32>} : memref<8x32xf32, #tpu.memory_space<vmem>>, vector<8x32xf32>,
    %c0_92 = arith.constant 0 : index
    %c0_93 = arith.constant 0 : index
    %183 = vector.load %arg8[%c0_92, %c0_93] : memref<8x32xf32, #tpu.memory_space<vmem>>, vector<8x32xf32>
    %184 = vector.shape_cast %157 : vector<8x1xi1> to vector<8x1xi1>
    %185 = vector.broadcast %184 : vector<8x1xi1> to vector<8x32xi1>
    %186 = arith.select %185, %177, %183 : vector<8x32xi1>, vector<8x32xf32>
    %c0_94 = arith.constant 0 : index
    %c0_95 = arith.constant 0 : index
    %187 = vector.load %arg8[%c0_94, %c0_95] : memref<8x32xf32, #tpu.memory_space<vmem>>, vector<8x32xf32>
    tpu.vector_store %arg8[%c0_94, %c0_95], %186 {strides = array<i32>} : memref<8x32xf32, #tpu.memory_space<vmem>>, vector<8x32xf32>,
    %c7_i32_96 = arith.constant 7 : i32
    %188 = arith.subi %c7_i32_96, %c2_i32 : i32
    %189 = arith.index_cast %188 : i32 to index
    %c0_97 = arith.constant 0 : index
    %c0_98 = arith.constant 0 : index
    %190 = vector.load %arg4[%189, %c0_97, %c0_98] : memref<8x8x128xf32, #tpu.memory_space<vmem>>, vector<1x8x128xf32>
    %191 = vector.shape_cast %190 : vector<1x8x128xf32> to vector<8x128xf32>
    %192 = vector.broadcast %152 : i32 to vector<8x1xi32>
    %193 = arith.cmpi sgt, %3, %192 : vector<8x1xi32>
    %c0_99 = arith.constant 0 : index
    %c0_100 = arith.constant 0 : index
    %194 = vector.load %arg10[%c0_99, %c0_100] : memref<8x32xf32, #tpu.memory_space<vmem>>, vector<8x32xf32>
    %c0_101 = arith.constant 0 : index
    %c0_102 = arith.constant 0 : index
    %195 = vector.load %arg6[%c0_101, %c0_102] : memref<32x128xf32, #tpu.memory_space<vmem>>, vector<32x128xf32>
    %cst_103 = arith.constant dense<0.000000e+00> : vector<8x128xf32>
    %196 = tpu.matmul %194, %195, %cst_103 {dimension_numbers = #tpu.dot_dimension_numbers<[1], [0], [0], [1], [0, 0, 1, 1], [], []>} : vector<8x32xf32>, vector<32x128xf32>, vector<8x128xf32> -> vector<8x128xf32>
    %197 = arith.addf %191, %196 : vector<8x128xf32>
    %198 = arith.negf %197 : vector<8x128xf32>
    %199 = math.exp %198 : vector<8x128xf32>
    %cst_104 = arith.constant 1.000000e+00 : f32
    %200 = vector.broadcast %cst_104 : f32 to vector<8x128xf32>
    %201 = arith.addf %200, %199 : vector<8x128xf32>
    %202 = arith.divf %200, %201 : vector<8x128xf32>
    %203 = math.tanh %197 : vector<8x128xf32>
    %204 = vector.extract_strided_slice %202 {offsets = [0, 0], sizes = [8, 32], strides = [1, 1]} : vector<8x128xf32> to vector<8x32xf32>
    %205 = vector.extract_strided_slice %202 {offsets = [0, 32], sizes = [8, 32], strides = [1, 1]} : vector<8x128xf32> to vector<8x32xf32>
    %206 = vector.extract_strided_slice %203 {offsets = [0, 64], sizes = [8, 32], strides = [1, 1]} : vector<8x128xf32> to vector<8x32xf32>
    %207 = vector.extract_strided_slice %202 {offsets = [0, 96], sizes = [8, 32], strides = [1, 1]} : vector<8x128xf32> to vector<8x32xf32>
    %c0_105 = arith.constant 0 : index
    %c0_106 = arith.constant 0 : index
    %208 = vector.load %arg11[%c0_105, %c0_106] : memref<8x32xf32, #tpu.memory_space<vmem>>, vector<8x32xf32>
    %209 = arith.mulf %205, %208 : vector<8x32xf32>
    %210 = arith.mulf %204, %206 : vector<8x32xf32>
    %211 = arith.addf %209, %210 : vector<8x32xf32>
    %212 = math.tanh %211 : vector<8x32xf32>
    %213 = arith.mulf %207, %212 : vector<8x32xf32>
    %c0_107 = arith.constant 0 : index
    %c0_108 = arith.constant 0 : index
    %214 = vector.load %arg11[%c0_107, %c0_108] : memref<8x32xf32, #tpu.memory_space<vmem>>, vector<8x32xf32>
    %215 = vector.shape_cast %193 : vector<8x1xi1> to vector<8x1xi1>
    %216 = vector.broadcast %215 : vector<8x1xi1> to vector<8x32xi1>
    %217 = arith.select %216, %211, %214 : vector<8x32xi1>, vector<8x32xf32>
    %c0_109 = arith.constant 0 : index
    %c0_110 = arith.constant 0 : index
    %218 = vector.load %arg11[%c0_109, %c0_110] : memref<8x32xf32, #tpu.memory_space<vmem>>, vector<8x32xf32>
    tpu.vector_store %arg11[%c0_109, %c0_110], %217 {strides = array<i32>} : memref<8x32xf32, #tpu.memory_space<vmem>>, vector<8x32xf32>,
    %c0_111 = arith.constant 0 : index
    %c0_112 = arith.constant 0 : index
    %219 = vector.load %arg10[%c0_111, %c0_112] : memref<8x32xf32, #tpu.memory_space<vmem>>, vector<8x32xf32>
    %220 = vector.shape_cast %193 : vector<8x1xi1> to vector<8x1xi1>
    %221 = vector.broadcast %220 : vector<8x1xi1> to vector<8x32xi1>
    %222 = arith.select %221, %213, %219 : vector<8x32xi1>, vector<8x32xf32>
    %c0_113 = arith.constant 0 : index
    %c0_114 = arith.constant 0 : index
    %223 = vector.load %arg10[%c0_113, %c0_114] : memref<8x32xf32, #tpu.memory_space<vmem>>, vector<8x32xf32>
    tpu.vector_store %arg10[%c0_113, %c0_114], %222 {strides = array<i32>} : memref<8x32xf32, #tpu.memory_space<vmem>>, vector<8x32xf32>,
    %c3_i32 = arith.constant 3 : i32
    %224 = arith.addi %4, %c3_i32 : i32
    %c7_i32_115 = arith.constant 7 : i32
    %225 = arith.subi %c7_i32_115, %224 : i32
    %226 = arith.index_cast %c3_i32 : i32 to index
    %c0_116 = arith.constant 0 : index
    %c0_117 = arith.constant 0 : index
    %227 = vector.load %arg3[%226, %c0_116, %c0_117] : memref<8x8x128xf32, #tpu.memory_space<vmem>>, vector<1x8x128xf32>
    %228 = vector.shape_cast %227 : vector<1x8x128xf32> to vector<8x128xf32>
    %229 = vector.broadcast %224 : i32 to vector<8x1xi32>
    %230 = arith.cmpi sgt, %3, %229 : vector<8x1xi32>
    %c0_118 = arith.constant 0 : index
    %c0_119 = arith.constant 0 : index
    %231 = vector.load %arg8[%c0_118, %c0_119] : memref<8x32xf32, #tpu.memory_space<vmem>>, vector<8x32xf32>
    %c0_120 = arith.constant 0 : index
    %c0_121 = arith.constant 0 : index
    %232 = vector.load %arg5[%c0_120, %c0_121] : memref<32x128xf32, #tpu.memory_space<vmem>>, vector<32x128xf32>
    %cst_122 = arith.constant dense<0.000000e+00> : vector<8x128xf32>
    %233 = tpu.matmul %231, %232, %cst_122 {dimension_numbers = #tpu.dot_dimension_numbers<[1], [0], [0], [1], [0, 0, 1, 1], [], []>} : vector<8x32xf32>, vector<32x128xf32>, vector<8x128xf32> -> vector<8x128xf32>
    %234 = arith.addf %228, %233 : vector<8x128xf32>
    %235 = arith.negf %234 : vector<8x128xf32>
    %236 = math.exp %235 : vector<8x128xf32>
    %cst_123 = arith.constant 1.000000e+00 : f32
    %237 = vector.broadcast %cst_123 : f32 to vector<8x128xf32>
    %238 = arith.addf %237, %236 : vector<8x128xf32>
    %239 = arith.divf %237, %238 : vector<8x128xf32>
    %240 = math.tanh %234 : vector<8x128xf32>
    %241 = vector.extract_strided_slice %239 {offsets = [0, 0], sizes = [8, 32], strides = [1, 1]} : vector<8x128xf32> to vector<8x32xf32>
    %242 = vector.extract_strided_slice %239 {offsets = [0, 32], sizes = [8, 32], strides = [1, 1]} : vector<8x128xf32> to vector<8x32xf32>
    %243 = vector.extract_strided_slice %240 {offsets = [0, 64], sizes = [8, 32], strides = [1, 1]} : vector<8x128xf32> to vector<8x32xf32>
    %244 = vector.extract_strided_slice %239 {offsets = [0, 96], sizes = [8, 32], strides = [1, 1]} : vector<8x128xf32> to vector<8x32xf32>
    %c0_124 = arith.constant 0 : index
    %c0_125 = arith.constant 0 : index
    %245 = vector.load %arg9[%c0_124, %c0_125] : memref<8x32xf32, #tpu.memory_space<vmem>>, vector<8x32xf32>
    %246 = arith.mulf %242, %245 : vector<8x32xf32>
    %247 = arith.mulf %241, %243 : vector<8x32xf32>
    %248 = arith.addf %246, %247 : vector<8x32xf32>
    %249 = math.tanh %248 : vector<8x32xf32>
    %250 = arith.mulf %244, %249 : vector<8x32xf32>
    %c0_126 = arith.constant 0 : index
    %c0_127 = arith.constant 0 : index
    %251 = vector.load %arg9[%c0_126, %c0_127] : memref<8x32xf32, #tpu.memory_space<vmem>>, vector<8x32xf32>
    %252 = vector.shape_cast %230 : vector<8x1xi1> to vector<8x1xi1>
    %253 = vector.broadcast %252 : vector<8x1xi1> to vector<8x32xi1>
    %254 = arith.select %253, %248, %251 : vector<8x32xi1>, vector<8x32xf32>
    %c0_128 = arith.constant 0 : index
    %c0_129 = arith.constant 0 : index
    %255 = vector.load %arg9[%c0_128, %c0_129] : memref<8x32xf32, #tpu.memory_space<vmem>>, vector<8x32xf32>
    tpu.vector_store %arg9[%c0_128, %c0_129], %254 {strides = array<i32>} : memref<8x32xf32, #tpu.memory_space<vmem>>, vector<8x32xf32>,
    %c0_130 = arith.constant 0 : index
    %c0_131 = arith.constant 0 : index
    %256 = vector.load %arg8[%c0_130, %c0_131] : memref<8x32xf32, #tpu.memory_space<vmem>>, vector<8x32xf32>
    %257 = vector.shape_cast %230 : vector<8x1xi1> to vector<8x1xi1>
    %258 = vector.broadcast %257 : vector<8x1xi1> to vector<8x32xi1>
    %259 = arith.select %258, %250, %256 : vector<8x32xi1>, vector<8x32xf32>
    %c0_132 = arith.constant 0 : index
    %c0_133 = arith.constant 0 : index
    %260 = vector.load %arg8[%c0_132, %c0_133] : memref<8x32xf32, #tpu.memory_space<vmem>>, vector<8x32xf32>
    tpu.vector_store %arg8[%c0_132, %c0_133], %259 {strides = array<i32>} : memref<8x32xf32, #tpu.memory_space<vmem>>, vector<8x32xf32>,
    %c7_i32_134 = arith.constant 7 : i32
    %261 = arith.subi %c7_i32_134, %c3_i32 : i32
    %262 = arith.index_cast %261 : i32 to index
    %c0_135 = arith.constant 0 : index
    %c0_136 = arith.constant 0 : index
    %263 = vector.load %arg4[%262, %c0_135, %c0_136] : memref<8x8x128xf32, #tpu.memory_space<vmem>>, vector<1x8x128xf32>
    %264 = vector.shape_cast %263 : vector<1x8x128xf32> to vector<8x128xf32>
    %265 = vector.broadcast %225 : i32 to vector<8x1xi32>
    %266 = arith.cmpi sgt, %3, %265 : vector<8x1xi32>
    %c0_137 = arith.constant 0 : index
    %c0_138 = arith.constant 0 : index
    %267 = vector.load %arg10[%c0_137, %c0_138] : memref<8x32xf32, #tpu.memory_space<vmem>>, vector<8x32xf32>
    %c0_139 = arith.constant 0 : index
    %c0_140 = arith.constant 0 : index
    %268 = vector.load %arg6[%c0_139, %c0_140] : memref<32x128xf32, #tpu.memory_space<vmem>>, vector<32x128xf32>
    %cst_141 = arith.constant dense<0.000000e+00> : vector<8x128xf32>
    %269 = tpu.matmul %267, %268, %cst_141 {dimension_numbers = #tpu.dot_dimension_numbers<[1], [0], [0], [1], [0, 0, 1, 1], [], []>} : vector<8x32xf32>, vector<32x128xf32>, vector<8x128xf32> -> vector<8x128xf32>
    %270 = arith.addf %264, %269 : vector<8x128xf32>
    %271 = arith.negf %270 : vector<8x128xf32>
    %272 = math.exp %271 : vector<8x128xf32>
    %cst_142 = arith.constant 1.000000e+00 : f32
    %273 = vector.broadcast %cst_142 : f32 to vector<8x128xf32>
    %274 = arith.addf %273, %272 : vector<8x128xf32>
    %275 = arith.divf %273, %274 : vector<8x128xf32>
    %276 = math.tanh %270 : vector<8x128xf32>
    %277 = vector.extract_strided_slice %275 {offsets = [0, 0], sizes = [8, 32], strides = [1, 1]} : vector<8x128xf32> to vector<8x32xf32>
    %278 = vector.extract_strided_slice %275 {offsets = [0, 32], sizes = [8, 32], strides = [1, 1]} : vector<8x128xf32> to vector<8x32xf32>
    %279 = vector.extract_strided_slice %276 {offsets = [0, 64], sizes = [8, 32], strides = [1, 1]} : vector<8x128xf32> to vector<8x32xf32>
    %280 = vector.extract_strided_slice %275 {offsets = [0, 96], sizes = [8, 32], strides = [1, 1]} : vector<8x128xf32> to vector<8x32xf32>
    %c0_143 = arith.constant 0 : index
    %c0_144 = arith.constant 0 : index
    %281 = vector.load %arg11[%c0_143, %c0_144] : memref<8x32xf32, #tpu.memory_space<vmem>>, vector<8x32xf32>
    %282 = arith.mulf %278, %281 : vector<8x32xf32>
    %283 = arith.mulf %277, %279 : vector<8x32xf32>
    %284 = arith.addf %282, %283 : vector<8x32xf32>
    %285 = math.tanh %284 : vector<8x32xf32>
    %286 = arith.mulf %280, %285 : vector<8x32xf32>
    %c0_145 = arith.constant 0 : index
    %c0_146 = arith.constant 0 : index
    %287 = vector.load %arg11[%c0_145, %c0_146] : memref<8x32xf32, #tpu.memory_space<vmem>>, vector<8x32xf32>
    %288 = vector.shape_cast %266 : vector<8x1xi1> to vector<8x1xi1>
    %289 = vector.broadcast %288 : vector<8x1xi1> to vector<8x32xi1>
    %290 = arith.select %289, %284, %287 : vector<8x32xi1>, vector<8x32xf32>
    %c0_147 = arith.constant 0 : index
    %c0_148 = arith.constant 0 : index
    %291 = vector.load %arg11[%c0_147, %c0_148] : memref<8x32xf32, #tpu.memory_space<vmem>>, vector<8x32xf32>
    tpu.vector_store %arg11[%c0_147, %c0_148], %290 {strides = array<i32>} : memref<8x32xf32, #tpu.memory_space<vmem>>, vector<8x32xf32>,
    %c0_149 = arith.constant 0 : index
    %c0_150 = arith.constant 0 : index
    %292 = vector.load %arg10[%c0_149, %c0_150] : memref<8x32xf32, #tpu.memory_space<vmem>>, vector<8x32xf32>
    %293 = vector.shape_cast %266 : vector<8x1xi1> to vector<8x1xi1>
    %294 = vector.broadcast %293 : vector<8x1xi1> to vector<8x32xi1>
    %295 = arith.select %294, %286, %292 : vector<8x32xi1>, vector<8x32xf32>
    %c0_151 = arith.constant 0 : index
    %c0_152 = arith.constant 0 : index
    %296 = vector.load %arg10[%c0_151, %c0_152] : memref<8x32xf32, #tpu.memory_space<vmem>>, vector<8x32xf32>
    tpu.vector_store %arg10[%c0_151, %c0_152], %295 {strides = array<i32>} : memref<8x32xf32, #tpu.memory_space<vmem>>, vector<8x32xf32>,
    %c4_i32 = arith.constant 4 : i32
    %297 = arith.addi %4, %c4_i32 : i32
    %c7_i32_153 = arith.constant 7 : i32
    %298 = arith.subi %c7_i32_153, %297 : i32
    %299 = arith.index_cast %c4_i32 : i32 to index
    %c0_154 = arith.constant 0 : index
    %c0_155 = arith.constant 0 : index
    %300 = vector.load %arg3[%299, %c0_154, %c0_155] : memref<8x8x128xf32, #tpu.memory_space<vmem>>, vector<1x8x128xf32>
    %301 = vector.shape_cast %300 : vector<1x8x128xf32> to vector<8x128xf32>
    %302 = vector.broadcast %297 : i32 to vector<8x1xi32>
    %303 = arith.cmpi sgt, %3, %302 : vector<8x1xi32>
    %c0_156 = arith.constant 0 : index
    %c0_157 = arith.constant 0 : index
    %304 = vector.load %arg8[%c0_156, %c0_157] : memref<8x32xf32, #tpu.memory_space<vmem>>, vector<8x32xf32>
    %c0_158 = arith.constant 0 : index
    %c0_159 = arith.constant 0 : index
    %305 = vector.load %arg5[%c0_158, %c0_159] : memref<32x128xf32, #tpu.memory_space<vmem>>, vector<32x128xf32>
    %cst_160 = arith.constant dense<0.000000e+00> : vector<8x128xf32>
    %306 = tpu.matmul %304, %305, %cst_160 {dimension_numbers = #tpu.dot_dimension_numbers<[1], [0], [0], [1], [0, 0, 1, 1], [], []>} : vector<8x32xf32>, vector<32x128xf32>, vector<8x128xf32> -> vector<8x128xf32>
    %307 = arith.addf %301, %306 : vector<8x128xf32>
    %308 = arith.negf %307 : vector<8x128xf32>
    %309 = math.exp %308 : vector<8x128xf32>
    %cst_161 = arith.constant 1.000000e+00 : f32
    %310 = vector.broadcast %cst_161 : f32 to vector<8x128xf32>
    %311 = arith.addf %310, %309 : vector<8x128xf32>
    %312 = arith.divf %310, %311 : vector<8x128xf32>
    %313 = math.tanh %307 : vector<8x128xf32>
    %314 = vector.extract_strided_slice %312 {offsets = [0, 0], sizes = [8, 32], strides = [1, 1]} : vector<8x128xf32> to vector<8x32xf32>
    %315 = vector.extract_strided_slice %312 {offsets = [0, 32], sizes = [8, 32], strides = [1, 1]} : vector<8x128xf32> to vector<8x32xf32>
    %316 = vector.extract_strided_slice %313 {offsets = [0, 64], sizes = [8, 32], strides = [1, 1]} : vector<8x128xf32> to vector<8x32xf32>
    %317 = vector.extract_strided_slice %312 {offsets = [0, 96], sizes = [8, 32], strides = [1, 1]} : vector<8x128xf32> to vector<8x32xf32>
    %c0_162 = arith.constant 0 : index
    %c0_163 = arith.constant 0 : index
    %318 = vector.load %arg9[%c0_162, %c0_163] : memref<8x32xf32, #tpu.memory_space<vmem>>, vector<8x32xf32>
    %319 = arith.mulf %315, %318 : vector<8x32xf32>
    %320 = arith.mulf %314, %316 : vector<8x32xf32>
    %321 = arith.addf %319, %320 : vector<8x32xf32>
    %322 = math.tanh %321 : vector<8x32xf32>
    %323 = arith.mulf %317, %322 : vector<8x32xf32>
    %c0_164 = arith.constant 0 : index
    %c0_165 = arith.constant 0 : index
    %324 = vector.load %arg9[%c0_164, %c0_165] : memref<8x32xf32, #tpu.memory_space<vmem>>, vector<8x32xf32>
    %325 = vector.shape_cast %303 : vector<8x1xi1> to vector<8x1xi1>
    %326 = vector.broadcast %325 : vector<8x1xi1> to vector<8x32xi1>
    %327 = arith.select %326, %321, %324 : vector<8x32xi1>, vector<8x32xf32>
    %c0_166 = arith.constant 0 : index
    %c0_167 = arith.constant 0 : index
    %328 = vector.load %arg9[%c0_166, %c0_167] : memref<8x32xf32, #tpu.memory_space<vmem>>, vector<8x32xf32>
    tpu.vector_store %arg9[%c0_166, %c0_167], %327 {strides = array<i32>} : memref<8x32xf32, #tpu.memory_space<vmem>>, vector<8x32xf32>,
    %c0_168 = arith.constant 0 : index
    %c0_169 = arith.constant 0 : index
    %329 = vector.load %arg8[%c0_168, %c0_169] : memref<8x32xf32, #tpu.memory_space<vmem>>, vector<8x32xf32>
    %330 = vector.shape_cast %303 : vector<8x1xi1> to vector<8x1xi1>
    %331 = vector.broadcast %330 : vector<8x1xi1> to vector<8x32xi1>
    %332 = arith.select %331, %323, %329 : vector<8x32xi1>, vector<8x32xf32>
    %c0_170 = arith.constant 0 : index
    %c0_171 = arith.constant 0 : index
    %333 = vector.load %arg8[%c0_170, %c0_171] : memref<8x32xf32, #tpu.memory_space<vmem>>, vector<8x32xf32>
    tpu.vector_store %arg8[%c0_170, %c0_171], %332 {strides = array<i32>} : memref<8x32xf32, #tpu.memory_space<vmem>>, vector<8x32xf32>,
    %c7_i32_172 = arith.constant 7 : i32
    %334 = arith.subi %c7_i32_172, %c4_i32 : i32
    %335 = arith.index_cast %334 : i32 to index
    %c0_173 = arith.constant 0 : index
    %c0_174 = arith.constant 0 : index
    %336 = vector.load %arg4[%335, %c0_173, %c0_174] : memref<8x8x128xf32, #tpu.memory_space<vmem>>, vector<1x8x128xf32>
    %337 = vector.shape_cast %336 : vector<1x8x128xf32> to vector<8x128xf32>
    %338 = vector.broadcast %298 : i32 to vector<8x1xi32>
    %339 = arith.cmpi sgt, %3, %338 : vector<8x1xi32>
    %c0_175 = arith.constant 0 : index
    %c0_176 = arith.constant 0 : index
    %340 = vector.load %arg10[%c0_175, %c0_176] : memref<8x32xf32, #tpu.memory_space<vmem>>, vector<8x32xf32>
    %c0_177 = arith.constant 0 : index
    %c0_178 = arith.constant 0 : index
    %341 = vector.load %arg6[%c0_177, %c0_178] : memref<32x128xf32, #tpu.memory_space<vmem>>, vector<32x128xf32>
    %cst_179 = arith.constant dense<0.000000e+00> : vector<8x128xf32>
    %342 = tpu.matmul %340, %341, %cst_179 {dimension_numbers = #tpu.dot_dimension_numbers<[1], [0], [0], [1], [0, 0, 1, 1], [], []>} : vector<8x32xf32>, vector<32x128xf32>, vector<8x128xf32> -> vector<8x128xf32>
    %343 = arith.addf %337, %342 : vector<8x128xf32>
    %344 = arith.negf %343 : vector<8x128xf32>
    %345 = math.exp %344 : vector<8x128xf32>
    %cst_180 = arith.constant 1.000000e+00 : f32
    %346 = vector.broadcast %cst_180 : f32 to vector<8x128xf32>
    %347 = arith.addf %346, %345 : vector<8x128xf32>
    %348 = arith.divf %346, %347 : vector<8x128xf32>
    %349 = math.tanh %343 : vector<8x128xf32>
    %350 = vector.extract_strided_slice %348 {offsets = [0, 0], sizes = [8, 32], strides = [1, 1]} : vector<8x128xf32> to vector<8x32xf32>
    %351 = vector.extract_strided_slice %348 {offsets = [0, 32], sizes = [8, 32], strides = [1, 1]} : vector<8x128xf32> to vector<8x32xf32>
    %352 = vector.extract_strided_slice %349 {offsets = [0, 64], sizes = [8, 32], strides = [1, 1]} : vector<8x128xf32> to vector<8x32xf32>
    %353 = vector.extract_strided_slice %348 {offsets = [0, 96], sizes = [8, 32], strides = [1, 1]} : vector<8x128xf32> to vector<8x32xf32>
    %c0_181 = arith.constant 0 : index
    %c0_182 = arith.constant 0 : index
    %354 = vector.load %arg11[%c0_181, %c0_182] : memref<8x32xf32, #tpu.memory_space<vmem>>, vector<8x32xf32>
    %355 = arith.mulf %351, %354 : vector<8x32xf32>
    %356 = arith.mulf %350, %352 : vector<8x32xf32>
    %357 = arith.addf %355, %356 : vector<8x32xf32>
    %358 = math.tanh %357 : vector<8x32xf32>
    %359 = arith.mulf %353, %358 : vector<8x32xf32>
    %c0_183 = arith.constant 0 : index
    %c0_184 = arith.constant 0 : index
    %360 = vector.load %arg11[%c0_183, %c0_184] : memref<8x32xf32, #tpu.memory_space<vmem>>, vector<8x32xf32>
    %361 = vector.shape_cast %339 : vector<8x1xi1> to vector<8x1xi1>
    %362 = vector.broadcast %361 : vector<8x1xi1> to vector<8x32xi1>
    %363 = arith.select %362, %357, %360 : vector<8x32xi1>, vector<8x32xf32>
    %c0_185 = arith.constant 0 : index
    %c0_186 = arith.constant 0 : index
    %364 = vector.load %arg11[%c0_185, %c0_186] : memref<8x32xf32, #tpu.memory_space<vmem>>, vector<8x32xf32>
    tpu.vector_store %arg11[%c0_185, %c0_186], %363 {strides = array<i32>} : memref<8x32xf32, #tpu.memory_space<vmem>>, vector<8x32xf32>,
    %c0_187 = arith.constant 0 : index
    %c0_188 = arith.constant 0 : index
    %365 = vector.load %arg10[%c0_187, %c0_188] : memref<8x32xf32, #tpu.memory_space<vmem>>, vector<8x32xf32>
    %366 = vector.shape_cast %339 : vector<8x1xi1> to vector<8x1xi1>
    %367 = vector.broadcast %366 : vector<8x1xi1> to vector<8x32xi1>
    %368 = arith.select %367, %359, %365 : vector<8x32xi1>, vector<8x32xf32>
    %c0_189 = arith.constant 0 : index
    %c0_190 = arith.constant 0 : index
    %369 = vector.load %arg10[%c0_189, %c0_190] : memref<8x32xf32, #tpu.memory_space<vmem>>, vector<8x32xf32>
    tpu.vector_store %arg10[%c0_189, %c0_190], %368 {strides = array<i32>} : memref<8x32xf32, #tpu.memory_space<vmem>>, vector<8x32xf32>,
    %c5_i32 = arith.constant 5 : i32
    %370 = arith.addi %4, %c5_i32 : i32
    %c7_i32_191 = arith.constant 7 : i32
    %371 = arith.subi %c7_i32_191, %370 : i32
    %372 = arith.index_cast %c5_i32 : i32 to index
    %c0_192 = arith.constant 0 : index
    %c0_193 = arith.constant 0 : index
    %373 = vector.load %arg3[%372, %c0_192, %c0_193] : memref<8x8x128xf32, #tpu.memory_space<vmem>>, vector<1x8x128xf32>
    %374 = vector.shape_cast %373 : vector<1x8x128xf32> to vector<8x128xf32>
    %375 = vector.broadcast %370 : i32 to vector<8x1xi32>
    %376 = arith.cmpi sgt, %3, %375 : vector<8x1xi32>
    %c0_194 = arith.constant 0 : index
    %c0_195 = arith.constant 0 : index
    %377 = vector.load %arg8[%c0_194, %c0_195] : memref<8x32xf32, #tpu.memory_space<vmem>>, vector<8x32xf32>
    %c0_196 = arith.constant 0 : index
    %c0_197 = arith.constant 0 : index
    %378 = vector.load %arg5[%c0_196, %c0_197] : memref<32x128xf32, #tpu.memory_space<vmem>>, vector<32x128xf32>
    %cst_198 = arith.constant dense<0.000000e+00> : vector<8x128xf32>
    %379 = tpu.matmul %377, %378, %cst_198 {dimension_numbers = #tpu.dot_dimension_numbers<[1], [0], [0], [1], [0, 0, 1, 1], [], []>} : vector<8x32xf32>, vector<32x128xf32>, vector<8x128xf32> -> vector<8x128xf32>
    %380 = arith.addf %374, %379 : vector<8x128xf32>
    %381 = arith.negf %380 : vector<8x128xf32>
    %382 = math.exp %381 : vector<8x128xf32>
    %cst_199 = arith.constant 1.000000e+00 : f32
    %383 = vector.broadcast %cst_199 : f32 to vector<8x128xf32>
    %384 = arith.addf %383, %382 : vector<8x128xf32>
    %385 = arith.divf %383, %384 : vector<8x128xf32>
    %386 = math.tanh %380 : vector<8x128xf32>
    %387 = vector.extract_strided_slice %385 {offsets = [0, 0], sizes = [8, 32], strides = [1, 1]} : vector<8x128xf32> to vector<8x32xf32>
    %388 = vector.extract_strided_slice %385 {offsets = [0, 32], sizes = [8, 32], strides = [1, 1]} : vector<8x128xf32> to vector<8x32xf32>
    %389 = vector.extract_strided_slice %386 {offsets = [0, 64], sizes = [8, 32], strides = [1, 1]} : vector<8x128xf32> to vector<8x32xf32>
    %390 = vector.extract_strided_slice %385 {offsets = [0, 96], sizes = [8, 32], strides = [1, 1]} : vector<8x128xf32> to vector<8x32xf32>
    %c0_200 = arith.constant 0 : index
    %c0_201 = arith.constant 0 : index
    %391 = vector.load %arg9[%c0_200, %c0_201] : memref<8x32xf32, #tpu.memory_space<vmem>>, vector<8x32xf32>
    %392 = arith.mulf %388, %391 : vector<8x32xf32>
    %393 = arith.mulf %387, %389 : vector<8x32xf32>
    %394 = arith.addf %392, %393 : vector<8x32xf32>
    %395 = math.tanh %394 : vector<8x32xf32>
    %396 = arith.mulf %390, %395 : vector<8x32xf32>
    %c0_202 = arith.constant 0 : index
    %c0_203 = arith.constant 0 : index
    %397 = vector.load %arg9[%c0_202, %c0_203] : memref<8x32xf32, #tpu.memory_space<vmem>>, vector<8x32xf32>
    %398 = vector.shape_cast %376 : vector<8x1xi1> to vector<8x1xi1>
    %399 = vector.broadcast %398 : vector<8x1xi1> to vector<8x32xi1>
    %400 = arith.select %399, %394, %397 : vector<8x32xi1>, vector<8x32xf32>
    %c0_204 = arith.constant 0 : index
    %c0_205 = arith.constant 0 : index
    %401 = vector.load %arg9[%c0_204, %c0_205] : memref<8x32xf32, #tpu.memory_space<vmem>>, vector<8x32xf32>
    tpu.vector_store %arg9[%c0_204, %c0_205], %400 {strides = array<i32>} : memref<8x32xf32, #tpu.memory_space<vmem>>, vector<8x32xf32>,
    %c0_206 = arith.constant 0 : index
    %c0_207 = arith.constant 0 : index
    %402 = vector.load %arg8[%c0_206, %c0_207] : memref<8x32xf32, #tpu.memory_space<vmem>>, vector<8x32xf32>
    %403 = vector.shape_cast %376 : vector<8x1xi1> to vector<8x1xi1>
    %404 = vector.broadcast %403 : vector<8x1xi1> to vector<8x32xi1>
    %405 = arith.select %404, %396, %402 : vector<8x32xi1>, vector<8x32xf32>
    %c0_208 = arith.constant 0 : index
    %c0_209 = arith.constant 0 : index
    %406 = vector.load %arg8[%c0_208, %c0_209] : memref<8x32xf32, #tpu.memory_space<vmem>>, vector<8x32xf32>
    tpu.vector_store %arg8[%c0_208, %c0_209], %405 {strides = array<i32>} : memref<8x32xf32, #tpu.memory_space<vmem>>, vector<8x32xf32>,
    %c7_i32_210 = arith.constant 7 : i32
    %407 = arith.subi %c7_i32_210, %c5_i32 : i32
    %408 = arith.index_cast %407 : i32 to index
    %c0_211 = arith.constant 0 : index
    %c0_212 = arith.constant 0 : index
    %409 = vector.load %arg4[%408, %c0_211, %c0_212] : memref<8x8x128xf32, #tpu.memory_space<vmem>>, vector<1x8x128xf32>
    %410 = vector.shape_cast %409 : vector<1x8x128xf32> to vector<8x128xf32>
    %411 = vector.broadcast %371 : i32 to vector<8x1xi32>
    %412 = arith.cmpi sgt, %3, %411 : vector<8x1xi32>
    %c0_213 = arith.constant 0 : index
    %c0_214 = arith.constant 0 : index
    %413 = vector.load %arg10[%c0_213, %c0_214] : memref<8x32xf32, #tpu.memory_space<vmem>>, vector<8x32xf32>
    %c0_215 = arith.constant 0 : index
    %c0_216 = arith.constant 0 : index
    %414 = vector.load %arg6[%c0_215, %c0_216] : memref<32x128xf32, #tpu.memory_space<vmem>>, vector<32x128xf32>
    %cst_217 = arith.constant dense<0.000000e+00> : vector<8x128xf32>
    %415 = tpu.matmul %413, %414, %cst_217 {dimension_numbers = #tpu.dot_dimension_numbers<[1], [0], [0], [1], [0, 0, 1, 1], [], []>} : vector<8x32xf32>, vector<32x128xf32>, vector<8x128xf32> -> vector<8x128xf32>
    %416 = arith.addf %410, %415 : vector<8x128xf32>
    %417 = arith.negf %416 : vector<8x128xf32>
    %418 = math.exp %417 : vector<8x128xf32>
    %cst_218 = arith.constant 1.000000e+00 : f32
    %419 = vector.broadcast %cst_218 : f32 to vector<8x128xf32>
    %420 = arith.addf %419, %418 : vector<8x128xf32>
    %421 = arith.divf %419, %420 : vector<8x128xf32>
    %422 = math.tanh %416 : vector<8x128xf32>
    %423 = vector.extract_strided_slice %421 {offsets = [0, 0], sizes = [8, 32], strides = [1, 1]} : vector<8x128xf32> to vector<8x32xf32>
    %424 = vector.extract_strided_slice %421 {offsets = [0, 32], sizes = [8, 32], strides = [1, 1]} : vector<8x128xf32> to vector<8x32xf32>
    %425 = vector.extract_strided_slice %422 {offsets = [0, 64], sizes = [8, 32], strides = [1, 1]} : vector<8x128xf32> to vector<8x32xf32>
    %426 = vector.extract_strided_slice %421 {offsets = [0, 96], sizes = [8, 32], strides = [1, 1]} : vector<8x128xf32> to vector<8x32xf32>
    %c0_219 = arith.constant 0 : index
    %c0_220 = arith.constant 0 : index
    %427 = vector.load %arg11[%c0_219, %c0_220] : memref<8x32xf32, #tpu.memory_space<vmem>>, vector<8x32xf32>
    %428 = arith.mulf %424, %427 : vector<8x32xf32>
    %429 = arith.mulf %423, %425 : vector<8x32xf32>
    %430 = arith.addf %428, %429 : vector<8x32xf32>
    %431 = math.tanh %430 : vector<8x32xf32>
    %432 = arith.mulf %426, %431 : vector<8x32xf32>
    %c0_221 = arith.constant 0 : index
    %c0_222 = arith.constant 0 : index
    %433 = vector.load %arg11[%c0_221, %c0_222] : memref<8x32xf32, #tpu.memory_space<vmem>>, vector<8x32xf32>
    %434 = vector.shape_cast %412 : vector<8x1xi1> to vector<8x1xi1>
    %435 = vector.broadcast %434 : vector<8x1xi1> to vector<8x32xi1>
    %436 = arith.select %435, %430, %433 : vector<8x32xi1>, vector<8x32xf32>
    %c0_223 = arith.constant 0 : index
    %c0_224 = arith.constant 0 : index
    %437 = vector.load %arg11[%c0_223, %c0_224] : memref<8x32xf32, #tpu.memory_space<vmem>>, vector<8x32xf32>
    tpu.vector_store %arg11[%c0_223, %c0_224], %436 {strides = array<i32>} : memref<8x32xf32, #tpu.memory_space<vmem>>, vector<8x32xf32>,
    %c0_225 = arith.constant 0 : index
    %c0_226 = arith.constant 0 : index
    %438 = vector.load %arg10[%c0_225, %c0_226] : memref<8x32xf32, #tpu.memory_space<vmem>>, vector<8x32xf32>
    %439 = vector.shape_cast %412 : vector<8x1xi1> to vector<8x1xi1>
    %440 = vector.broadcast %439 : vector<8x1xi1> to vector<8x32xi1>
    %441 = arith.select %440, %432, %438 : vector<8x32xi1>, vector<8x32xf32>
    %c0_227 = arith.constant 0 : index
    %c0_228 = arith.constant 0 : index
    %442 = vector.load %arg10[%c0_227, %c0_228] : memref<8x32xf32, #tpu.memory_space<vmem>>, vector<8x32xf32>
    tpu.vector_store %arg10[%c0_227, %c0_228], %441 {strides = array<i32>} : memref<8x32xf32, #tpu.memory_space<vmem>>, vector<8x32xf32>,
    %c6_i32 = arith.constant 6 : i32
    %443 = arith.addi %4, %c6_i32 : i32
    %c7_i32_229 = arith.constant 7 : i32
    %444 = arith.subi %c7_i32_229, %443 : i32
    %445 = arith.index_cast %c6_i32 : i32 to index
    %c0_230 = arith.constant 0 : index
    %c0_231 = arith.constant 0 : index
    %446 = vector.load %arg3[%445, %c0_230, %c0_231] : memref<8x8x128xf32, #tpu.memory_space<vmem>>, vector<1x8x128xf32>
    %447 = vector.shape_cast %446 : vector<1x8x128xf32> to vector<8x128xf32>
    %448 = vector.broadcast %443 : i32 to vector<8x1xi32>
    %449 = arith.cmpi sgt, %3, %448 : vector<8x1xi32>
    %c0_232 = arith.constant 0 : index
    %c0_233 = arith.constant 0 : index
    %450 = vector.load %arg8[%c0_232, %c0_233] : memref<8x32xf32, #tpu.memory_space<vmem>>, vector<8x32xf32>
    %c0_234 = arith.constant 0 : index
    %c0_235 = arith.constant 0 : index
    %451 = vector.load %arg5[%c0_234, %c0_235] : memref<32x128xf32, #tpu.memory_space<vmem>>, vector<32x128xf32>
    %cst_236 = arith.constant dense<0.000000e+00> : vector<8x128xf32>
    %452 = tpu.matmul %450, %451, %cst_236 {dimension_numbers = #tpu.dot_dimension_numbers<[1], [0], [0], [1], [0, 0, 1, 1], [], []>} : vector<8x32xf32>, vector<32x128xf32>, vector<8x128xf32> -> vector<8x128xf32>
    %453 = arith.addf %447, %452 : vector<8x128xf32>
    %454 = arith.negf %453 : vector<8x128xf32>
    %455 = math.exp %454 : vector<8x128xf32>
    %cst_237 = arith.constant 1.000000e+00 : f32
    %456 = vector.broadcast %cst_237 : f32 to vector<8x128xf32>
    %457 = arith.addf %456, %455 : vector<8x128xf32>
    %458 = arith.divf %456, %457 : vector<8x128xf32>
    %459 = math.tanh %453 : vector<8x128xf32>
    %460 = vector.extract_strided_slice %458 {offsets = [0, 0], sizes = [8, 32], strides = [1, 1]} : vector<8x128xf32> to vector<8x32xf32>
    %461 = vector.extract_strided_slice %458 {offsets = [0, 32], sizes = [8, 32], strides = [1, 1]} : vector<8x128xf32> to vector<8x32xf32>
    %462 = vector.extract_strided_slice %459 {offsets = [0, 64], sizes = [8, 32], strides = [1, 1]} : vector<8x128xf32> to vector<8x32xf32>
    %463 = vector.extract_strided_slice %458 {offsets = [0, 96], sizes = [8, 32], strides = [1, 1]} : vector<8x128xf32> to vector<8x32xf32>
    %c0_238 = arith.constant 0 : index
    %c0_239 = arith.constant 0 : index
    %464 = vector.load %arg9[%c0_238, %c0_239] : memref<8x32xf32, #tpu.memory_space<vmem>>, vector<8x32xf32>
    %465 = arith.mulf %461, %464 : vector<8x32xf32>
    %466 = arith.mulf %460, %462 : vector<8x32xf32>
    %467 = arith.addf %465, %466 : vector<8x32xf32>
    %468 = math.tanh %467 : vector<8x32xf32>
    %469 = arith.mulf %463, %468 : vector<8x32xf32>
    %c0_240 = arith.constant 0 : index
    %c0_241 = arith.constant 0 : index
    %470 = vector.load %arg9[%c0_240, %c0_241] : memref<8x32xf32, #tpu.memory_space<vmem>>, vector<8x32xf32>
    %471 = vector.shape_cast %449 : vector<8x1xi1> to vector<8x1xi1>
    %472 = vector.broadcast %471 : vector<8x1xi1> to vector<8x32xi1>
    %473 = arith.select %472, %467, %470 : vector<8x32xi1>, vector<8x32xf32>
    %c0_242 = arith.constant 0 : index
    %c0_243 = arith.constant 0 : index
    %474 = vector.load %arg9[%c0_242, %c0_243] : memref<8x32xf32, #tpu.memory_space<vmem>>, vector<8x32xf32>
    tpu.vector_store %arg9[%c0_242, %c0_243], %473 {strides = array<i32>} : memref<8x32xf32, #tpu.memory_space<vmem>>, vector<8x32xf32>,
    %c0_244 = arith.constant 0 : index
    %c0_245 = arith.constant 0 : index
    %475 = vector.load %arg8[%c0_244, %c0_245] : memref<8x32xf32, #tpu.memory_space<vmem>>, vector<8x32xf32>
    %476 = vector.shape_cast %449 : vector<8x1xi1> to vector<8x1xi1>
    %477 = vector.broadcast %476 : vector<8x1xi1> to vector<8x32xi1>
    %478 = arith.select %477, %469, %475 : vector<8x32xi1>, vector<8x32xf32>
    %c0_246 = arith.constant 0 : index
    %c0_247 = arith.constant 0 : index
    %479 = vector.load %arg8[%c0_246, %c0_247] : memref<8x32xf32, #tpu.memory_space<vmem>>, vector<8x32xf32>
    tpu.vector_store %arg8[%c0_246, %c0_247], %478 {strides = array<i32>} : memref<8x32xf32, #tpu.memory_space<vmem>>, vector<8x32xf32>,
    %c7_i32_248 = arith.constant 7 : i32
    %480 = arith.subi %c7_i32_248, %c6_i32 : i32
    %481 = arith.index_cast %480 : i32 to index
    %c0_249 = arith.constant 0 : index
    %c0_250 = arith.constant 0 : index
    %482 = vector.load %arg4[%481, %c0_249, %c0_250] : memref<8x8x128xf32, #tpu.memory_space<vmem>>, vector<1x8x128xf32>
    %483 = vector.shape_cast %482 : vector<1x8x128xf32> to vector<8x128xf32>
    %484 = vector.broadcast %444 : i32 to vector<8x1xi32>
    %485 = arith.cmpi sgt, %3, %484 : vector<8x1xi32>
    %c0_251 = arith.constant 0 : index
    %c0_252 = arith.constant 0 : index
    %486 = vector.load %arg10[%c0_251, %c0_252] : memref<8x32xf32, #tpu.memory_space<vmem>>, vector<8x32xf32>
    %c0_253 = arith.constant 0 : index
    %c0_254 = arith.constant 0 : index
    %487 = vector.load %arg6[%c0_253, %c0_254] : memref<32x128xf32, #tpu.memory_space<vmem>>, vector<32x128xf32>
    %cst_255 = arith.constant dense<0.000000e+00> : vector<8x128xf32>
    %488 = tpu.matmul %486, %487, %cst_255 {dimension_numbers = #tpu.dot_dimension_numbers<[1], [0], [0], [1], [0, 0, 1, 1], [], []>} : vector<8x32xf32>, vector<32x128xf32>, vector<8x128xf32> -> vector<8x128xf32>
    %489 = arith.addf %483, %488 : vector<8x128xf32>
    %490 = arith.negf %489 : vector<8x128xf32>
    %491 = math.exp %490 : vector<8x128xf32>
    %cst_256 = arith.constant 1.000000e+00 : f32
    %492 = vector.broadcast %cst_256 : f32 to vector<8x128xf32>
    %493 = arith.addf %492, %491 : vector<8x128xf32>
    %494 = arith.divf %492, %493 : vector<8x128xf32>
    %495 = math.tanh %489 : vector<8x128xf32>
    %496 = vector.extract_strided_slice %494 {offsets = [0, 0], sizes = [8, 32], strides = [1, 1]} : vector<8x128xf32> to vector<8x32xf32>
    %497 = vector.extract_strided_slice %494 {offsets = [0, 32], sizes = [8, 32], strides = [1, 1]} : vector<8x128xf32> to vector<8x32xf32>
    %498 = vector.extract_strided_slice %495 {offsets = [0, 64], sizes = [8, 32], strides = [1, 1]} : vector<8x128xf32> to vector<8x32xf32>
    %499 = vector.extract_strided_slice %494 {offsets = [0, 96], sizes = [8, 32], strides = [1, 1]} : vector<8x128xf32> to vector<8x32xf32>
    %c0_257 = arith.constant 0 : index
    %c0_258 = arith.constant 0 : index
    %500 = vector.load %arg11[%c0_257, %c0_258] : memref<8x32xf32, #tpu.memory_space<vmem>>, vector<8x32xf32>
    %501 = arith.mulf %497, %500 : vector<8x32xf32>
    %502 = arith.mulf %496, %498 : vector<8x32xf32>
    %503 = arith.addf %501, %502 : vector<8x32xf32>
    %504 = math.tanh %503 : vector<8x32xf32>
    %505 = arith.mulf %499, %504 : vector<8x32xf32>
    %c0_259 = arith.constant 0 : index
    %c0_260 = arith.constant 0 : index
    %506 = vector.load %arg11[%c0_259, %c0_260] : memref<8x32xf32, #tpu.memory_space<vmem>>, vector<8x32xf32>
    %507 = vector.shape_cast %485 : vector<8x1xi1> to vector<8x1xi1>
    %508 = vector.broadcast %507 : vector<8x1xi1> to vector<8x32xi1>
    %509 = arith.select %508, %503, %506 : vector<8x32xi1>, vector<8x32xf32>
    %c0_261 = arith.constant 0 : index
    %c0_262 = arith.constant 0 : index
    %510 = vector.load %arg11[%c0_261, %c0_262] : memref<8x32xf32, #tpu.memory_space<vmem>>, vector<8x32xf32>
    tpu.vector_store %arg11[%c0_261, %c0_262], %509 {strides = array<i32>} : memref<8x32xf32, #tpu.memory_space<vmem>>, vector<8x32xf32>,
    %c0_263 = arith.constant 0 : index
    %c0_264 = arith.constant 0 : index
    %511 = vector.load %arg10[%c0_263, %c0_264] : memref<8x32xf32, #tpu.memory_space<vmem>>, vector<8x32xf32>
    %512 = vector.shape_cast %485 : vector<8x1xi1> to vector<8x1xi1>
    %513 = vector.broadcast %512 : vector<8x1xi1> to vector<8x32xi1>
    %514 = arith.select %513, %505, %511 : vector<8x32xi1>, vector<8x32xf32>
    %c0_265 = arith.constant 0 : index
    %c0_266 = arith.constant 0 : index
    %515 = vector.load %arg10[%c0_265, %c0_266] : memref<8x32xf32, #tpu.memory_space<vmem>>, vector<8x32xf32>
    tpu.vector_store %arg10[%c0_265, %c0_266], %514 {strides = array<i32>} : memref<8x32xf32, #tpu.memory_space<vmem>>, vector<8x32xf32>,
    %c7_i32_267 = arith.constant 7 : i32
    %516 = arith.addi %4, %c7_i32_267 : i32
    %c7_i32_268 = arith.constant 7 : i32
    %517 = arith.subi %c7_i32_268, %516 : i32
    %518 = arith.index_cast %c7_i32_267 : i32 to index
    %c0_269 = arith.constant 0 : index
    %c0_270 = arith.constant 0 : index
    %519 = vector.load %arg3[%518, %c0_269, %c0_270] : memref<8x8x128xf32, #tpu.memory_space<vmem>>, vector<1x8x128xf32>
    %520 = vector.shape_cast %519 : vector<1x8x128xf32> to vector<8x128xf32>
    %521 = vector.broadcast %516 : i32 to vector<8x1xi32>
    %522 = arith.cmpi sgt, %3, %521 : vector<8x1xi32>
    %c0_271 = arith.constant 0 : index
    %c0_272 = arith.constant 0 : index
    %523 = vector.load %arg8[%c0_271, %c0_272] : memref<8x32xf32, #tpu.memory_space<vmem>>, vector<8x32xf32>
    %c0_273 = arith.constant 0 : index
    %c0_274 = arith.constant 0 : index
    %524 = vector.load %arg5[%c0_273, %c0_274] : memref<32x128xf32, #tpu.memory_space<vmem>>, vector<32x128xf32>
    %cst_275 = arith.constant dense<0.000000e+00> : vector<8x128xf32>
    %525 = tpu.matmul %523, %524, %cst_275 {dimension_numbers = #tpu.dot_dimension_numbers<[1], [0], [0], [1], [0, 0, 1, 1], [], []>} : vector<8x32xf32>, vector<32x128xf32>, vector<8x128xf32> -> vector<8x128xf32>
    %526 = arith.addf %520, %525 : vector<8x128xf32>
    %527 = arith.negf %526 : vector<8x128xf32>
    %528 = math.exp %527 : vector<8x128xf32>
    %cst_276 = arith.constant 1.000000e+00 : f32
    %529 = vector.broadcast %cst_276 : f32 to vector<8x128xf32>
    %530 = arith.addf %529, %528 : vector<8x128xf32>
    %531 = arith.divf %529, %530 : vector<8x128xf32>
    %532 = math.tanh %526 : vector<8x128xf32>
    %533 = vector.extract_strided_slice %531 {offsets = [0, 0], sizes = [8, 32], strides = [1, 1]} : vector<8x128xf32> to vector<8x32xf32>
    %534 = vector.extract_strided_slice %531 {offsets = [0, 32], sizes = [8, 32], strides = [1, 1]} : vector<8x128xf32> to vector<8x32xf32>
    %535 = vector.extract_strided_slice %532 {offsets = [0, 64], sizes = [8, 32], strides = [1, 1]} : vector<8x128xf32> to vector<8x32xf32>
    %536 = vector.extract_strided_slice %531 {offsets = [0, 96], sizes = [8, 32], strides = [1, 1]} : vector<8x128xf32> to vector<8x32xf32>
    %c0_277 = arith.constant 0 : index
    %c0_278 = arith.constant 0 : index
    %537 = vector.load %arg9[%c0_277, %c0_278] : memref<8x32xf32, #tpu.memory_space<vmem>>, vector<8x32xf32>
    %538 = arith.mulf %534, %537 : vector<8x32xf32>
    %539 = arith.mulf %533, %535 : vector<8x32xf32>
    %540 = arith.addf %538, %539 : vector<8x32xf32>
    %541 = math.tanh %540 : vector<8x32xf32>
    %542 = arith.mulf %536, %541 : vector<8x32xf32>
    %c0_279 = arith.constant 0 : index
    %c0_280 = arith.constant 0 : index
    %543 = vector.load %arg9[%c0_279, %c0_280] : memref<8x32xf32, #tpu.memory_space<vmem>>, vector<8x32xf32>
    %544 = vector.shape_cast %522 : vector<8x1xi1> to vector<8x1xi1>
    %545 = vector.broadcast %544 : vector<8x1xi1> to vector<8x32xi1>
    %546 = arith.select %545, %540, %543 : vector<8x32xi1>, vector<8x32xf32>
    %c0_281 = arith.constant 0 : index
    %c0_282 = arith.constant 0 : index
    %547 = vector.load %arg9[%c0_281, %c0_282] : memref<8x32xf32, #tpu.memory_space<vmem>>, vector<8x32xf32>
    tpu.vector_store %arg9[%c0_281, %c0_282], %546 {strides = array<i32>} : memref<8x32xf32, #tpu.memory_space<vmem>>, vector<8x32xf32>,
    %c0_283 = arith.constant 0 : index
    %c0_284 = arith.constant 0 : index
    %548 = vector.load %arg8[%c0_283, %c0_284] : memref<8x32xf32, #tpu.memory_space<vmem>>, vector<8x32xf32>
    %549 = vector.shape_cast %522 : vector<8x1xi1> to vector<8x1xi1>
    %550 = vector.broadcast %549 : vector<8x1xi1> to vector<8x32xi1>
    %551 = arith.select %550, %542, %548 : vector<8x32xi1>, vector<8x32xf32>
    %c0_285 = arith.constant 0 : index
    %c0_286 = arith.constant 0 : index
    %552 = vector.load %arg8[%c0_285, %c0_286] : memref<8x32xf32, #tpu.memory_space<vmem>>, vector<8x32xf32>
    tpu.vector_store %arg8[%c0_285, %c0_286], %551 {strides = array<i32>} : memref<8x32xf32, #tpu.memory_space<vmem>>, vector<8x32xf32>,
    %c7_i32_287 = arith.constant 7 : i32
    %553 = arith.subi %c7_i32_287, %c7_i32_267 : i32
    %554 = arith.index_cast %553 : i32 to index
    %c0_288 = arith.constant 0 : index
    %c0_289 = arith.constant 0 : index
    %555 = vector.load %arg4[%554, %c0_288, %c0_289] : memref<8x8x128xf32, #tpu.memory_space<vmem>>, vector<1x8x128xf32>
    %556 = vector.shape_cast %555 : vector<1x8x128xf32> to vector<8x128xf32>
    %557 = vector.broadcast %517 : i32 to vector<8x1xi32>
    %558 = arith.cmpi sgt, %3, %557 : vector<8x1xi32>
    %c0_290 = arith.constant 0 : index
    %c0_291 = arith.constant 0 : index
    %559 = vector.load %arg10[%c0_290, %c0_291] : memref<8x32xf32, #tpu.memory_space<vmem>>, vector<8x32xf32>
    %c0_292 = arith.constant 0 : index
    %c0_293 = arith.constant 0 : index
    %560 = vector.load %arg6[%c0_292, %c0_293] : memref<32x128xf32, #tpu.memory_space<vmem>>, vector<32x128xf32>
    %cst_294 = arith.constant dense<0.000000e+00> : vector<8x128xf32>
    %561 = tpu.matmul %559, %560, %cst_294 {dimension_numbers = #tpu.dot_dimension_numbers<[1], [0], [0], [1], [0, 0, 1, 1], [], []>} : vector<8x32xf32>, vector<32x128xf32>, vector<8x128xf32> -> vector<8x128xf32>
    %562 = arith.addf %556, %561 : vector<8x128xf32>
    %563 = arith.negf %562 : vector<8x128xf32>
    %564 = math.exp %563 : vector<8x128xf32>
    %cst_295 = arith.constant 1.000000e+00 : f32
    %565 = vector.broadcast %cst_295 : f32 to vector<8x128xf32>
    %566 = arith.addf %565, %564 : vector<8x128xf32>
    %567 = arith.divf %565, %566 : vector<8x128xf32>
    %568 = math.tanh %562 : vector<8x128xf32>
    %569 = vector.extract_strided_slice %567 {offsets = [0, 0], sizes = [8, 32], strides = [1, 1]} : vector<8x128xf32> to vector<8x32xf32>
    %570 = vector.extract_strided_slice %567 {offsets = [0, 32], sizes = [8, 32], strides = [1, 1]} : vector<8x128xf32> to vector<8x32xf32>
    %571 = vector.extract_strided_slice %568 {offsets = [0, 64], sizes = [8, 32], strides = [1, 1]} : vector<8x128xf32> to vector<8x32xf32>
    %572 = vector.extract_strided_slice %567 {offsets = [0, 96], sizes = [8, 32], strides = [1, 1]} : vector<8x128xf32> to vector<8x32xf32>
    %c0_296 = arith.constant 0 : index
    %c0_297 = arith.constant 0 : index
    %573 = vector.load %arg11[%c0_296, %c0_297] : memref<8x32xf32, #tpu.memory_space<vmem>>, vector<8x32xf32>
    %574 = arith.mulf %570, %573 : vector<8x32xf32>
    %575 = arith.mulf %569, %571 : vector<8x32xf32>
    %576 = arith.addf %574, %575 : vector<8x32xf32>
    %577 = math.tanh %576 : vector<8x32xf32>
    %578 = arith.mulf %572, %577 : vector<8x32xf32>
    %c0_298 = arith.constant 0 : index
    %c0_299 = arith.constant 0 : index
    %579 = vector.load %arg11[%c0_298, %c0_299] : memref<8x32xf32, #tpu.memory_space<vmem>>, vector<8x32xf32>
    %580 = vector.shape_cast %558 : vector<8x1xi1> to vector<8x1xi1>
    %581 = vector.broadcast %580 : vector<8x1xi1> to vector<8x32xi1>
    %582 = arith.select %581, %576, %579 : vector<8x32xi1>, vector<8x32xf32>
    %c0_300 = arith.constant 0 : index
    %c0_301 = arith.constant 0 : index
    %583 = vector.load %arg11[%c0_300, %c0_301] : memref<8x32xf32, #tpu.memory_space<vmem>>, vector<8x32xf32>
    tpu.vector_store %arg11[%c0_300, %c0_301], %582 {strides = array<i32>} : memref<8x32xf32, #tpu.memory_space<vmem>>, vector<8x32xf32>,
    %c0_302 = arith.constant 0 : index
    %c0_303 = arith.constant 0 : index
    %584 = vector.load %arg10[%c0_302, %c0_303] : memref<8x32xf32, #tpu.memory_space<vmem>>, vector<8x32xf32>
    %585 = vector.shape_cast %558 : vector<8x1xi1> to vector<8x1xi1>
    %586 = vector.broadcast %585 : vector<8x1xi1> to vector<8x32xi1>
    %587 = arith.select %586, %578, %584 : vector<8x32xi1>, vector<8x32xf32>
    %c0_304 = arith.constant 0 : index
    %c0_305 = arith.constant 0 : index
    %588 = vector.load %arg10[%c0_304, %c0_305] : memref<8x32xf32, #tpu.memory_space<vmem>>, vector<8x32xf32>
    tpu.vector_store %arg10[%c0_304, %c0_305], %587 {strides = array<i32>} : memref<8x32xf32, #tpu.memory_space<vmem>>, vector<8x32xf32>,
    %c8_i32_306 = arith.constant 8 : i32
    %c0_i32_307 = arith.constant 0 : i32
    %589 = arith.cmpi eq, %arg1, %c0_i32_307 : i32
    %590 = arith.extui %589 : i1 to i32
    %c0_i32_308 = arith.constant 0 : i32
    %591 = arith.cmpi ne, %590, %c0_i32_308 : i32
    scf.if %591 {
      %c0_309 = arith.constant 0 : index
      %c0_310 = arith.constant 0 : index
      %592 = vector.load %arg8[%c0_309, %c0_310] : memref<8x32xf32, #tpu.memory_space<vmem>>, vector<8x32xf32>
      %c0_311 = arith.constant 0 : index
      %c0_312 = arith.constant 0 : index
      %593 = vector.load %arg10[%c0_311, %c0_312] : memref<8x32xf32, #tpu.memory_space<vmem>>, vector<8x32xf32>
      %594 = tpu.concatenate %592, %593 in 1 : vector<8x32xf32>, vector<8x32xf32> -> vector<8x64xf32>
      %c0_313 = arith.constant 0 : index
      %c0_314 = arith.constant 0 : index
      %595 = vector.load %arg7[%c0_313, %c0_314] : memref<8x64xf32, #tpu.memory_space<vmem>>, vector<8x64xf32>
      tpu.vector_store %arg7[%c0_313, %c0_314], %594 {strides = array<i32>} : memref<8x64xf32, #tpu.memory_space<vmem>>, vector<8x64xf32>,
    } else {
    }
    return
  }
  func.func @transform_0(%arg0: i32, %arg1: i32) -> (i32, i32) {
    %c0_i32 = arith.constant 0 : i32
    %c0_i32_0 = arith.constant 0 : i32
    return %arg0, %c0_i32 : i32, i32
  }
  func.func @transform_1(%arg0: i32, %arg1: i32) -> (i32, i32, i32) {
    %c0_i32 = arith.constant 0 : i32
    %c0_i32_0 = arith.constant 0 : i32
    return %arg1, %arg0, %c0_i32 : i32, i32, i32
  }
  func.func @transform_2(%arg0: i32, %arg1: i32) -> (i32, i32, i32) {
    %c0_i32 = arith.constant 0 : i32
    %0 = arith.subi %c0_i32, %arg1 : i32
    %c0_i32_0 = arith.constant 0 : i32
    %c0_i32_1 = arith.constant 0 : i32
    return %0, %arg0, %c0_i32_0 : i32, i32, i32
  }
  func.func @transform_3(%arg0: i32, %arg1: i32) -> (i32, i32) {
    %c0_i32 = arith.constant 0 : i32
    %c0_i32_0 = arith.constant 0 : i32
    %c0_i32_1 = arith.constant 0 : i32
    return %c0_i32, %c0_i32_0 : i32, i32
  }
  func.func @transform_4(%arg0: i32, %arg1: i32) -> (i32, i32) {
    %c0_i32 = arith.constant 0 : i32
    %c0_i32_0 = arith.constant 0 : i32
    %c0_i32_1 = arith.constant 0 : i32
    return %c0_i32, %c0_i32_0 : i32, i32
  }
  func.func @transform_5(%arg0: i32, %arg1: i32) -> (i32, i32) {
    %c0_i32 = arith.constant 0 : i32
    %c0_i32_0 = arith.constant 0 : i32
    return %arg0, %c0_i32 : i32, i32
  }
}

</mosaic_0001>

<bundles_post_ra>
// kernel: tpu_custom_call.1
= control target key start
LH: loop header
LB: loop body
LE: loop exit
PB: predicated region body
PF: predicated region fallthrough
CT: control target
= control target key end

     0   :  { %10 = vsyncpa [#allocation7], 0  ;;  %s3318_s0 = inlined_call_operand.vmem [shape: s32[8,1], index: 0, kind: input, shape index: {}]   ;;  %s3319_s1 = inlined_call_operand.hbm [shape: f32[8,8,128], index: 1, kind: input, shape index: {}]   ;;  %s3320_s2 = inlined_call_operand.hbm [shape: f32[8,8,128], index: 2, kind: input, shape index: {}]   ;;  %s3321_s3 = inlined_call_operand.hbm [shape: f32[32,128], index: 3, kind: input, shape index: {}]   ;;  %s3322_s4 = inlined_call_operand.hbm [shape: f32[32,128], index: 4, kind: input, shape index: {}]   ;;  %s3323_s5 = inlined_call_operand.hbm [shape: f32[8,64], index: 5, kind: output, shape index: {}]  }
   0x1   :  { %11 = vsyncpa [#allocation10], 0 }
   0x2   :  { %12 = vsyncpa [#allocation13], 0 }
   0x3   :  { %13 = vsyncpa [#allocation8], 0  ;;  %s2821_s18 = smov [#allocation9]   ;;  %s2822_s20 = smov [#allocation6]  }
   0x4   :  { %s37_s19 = sshll.u32 %s2821_s18, 4  ;;  %s21_s21 = sshll.u32 %s2822_s20, 4  ;;  %s38_s19 = int_to_ptr.vmem [resolvable:$true] %s37_s19  ;;  %s22_s21 = int_to_ptr.vmem [resolvable:$true] %s21_s21 }
   0x5   :  { %s2721_s22 = scalar_lea.vmem %s38_s19, 1024  ;;  %p2726_p1 = scmp.lt.s32.totalorder %s38_s19, %s38_s19 }
   0x6   :  { %p2722_p0 = scmp.ne.s32.totalorder %s38_s19, %s2721_s22  ;;  %p2727_p2 = scmp.lt.s32.totalorder %s2721_s22, %s2721_s22 }
   0x8   :  { %p2728_p3 = por %p2727_p2, %p2726_p1 }
   0xa   :  { %p2729_p4 = pnand %p2728_p3, %p2722_p0 }
   0xc   :  { %2732 = shalt.err (!%p2729_p4)
}
   0xd   :  { %s2823_s23 = smov 128   ;;  %s2824_s24 = smov 8  }
   0xe   :  { %43 = dma.hbm_to_vmem [thread:$0]  %s3320_s2, 1024, %s38_s19, [#allocation10], %s2823_s23, %s2823_s23, %s2824_s24  }
   0xf   :  { %s2741_s27 = scalar_lea.vmem %s22_s21, 1024  ;;  %p2746_p6 = scmp.lt.s32.totalorder %s22_s21, %s22_s21 }
  0x10   :  { %p2742_p5 = scmp.ne.s32.totalorder %s22_s21, %s2741_s27  ;;  %p2747_p7 = scmp.lt.s32.totalorder %s2741_s27, %s2741_s27 }
  0x12   :  { %p2748_p8 = por %p2747_p7, %p2746_p6 }
  0x14   :  { %p2749_p9 = pnand %p2748_p8, %p2742_p5 }
  0x16   :  { %2752 = shalt.err (!%p2749_p9)
}
  0x17   :  { %27 = dma.hbm_to_vmem [thread:$0]  %s3319_s1, 1024, %s22_s21, [#allocation7], %s2823_s23, %s2823_s23, %s2824_s24  }
  0x18   :  { %s2825_s30 = smov [#allocation11]   ;;  %s2826_s7 = smov [#allocation12]  }
  0x19   :  { %s49_s6 = sshll.u32 %s2825_s30, 4  ;;  %s61_s8 = sshll.u32 %s2826_s7, 4  ;;  %s50_s6 = int_to_ptr.vmem [resolvable:$true] %s49_s6  ;;  %s62_s8 = int_to_ptr.vmem [resolvable:$true] %s61_s8 }
  0x1a   :  { %s2761_s2 = scalar_lea.vmem %s50_s6, 512  ;;  %p2766_p11 = scmp.lt.s32.totalorder %s50_s6, %s50_s6 }
  0x1b   :  { %p2762_p10 = scmp.ne.s32.totalorder %s50_s6, %s2761_s2  ;;  %p2767_p12 = scmp.lt.s32.totalorder %s2761_s2, %s2761_s2 }
  0x1d   :  { %p2768_p13 = por %p2767_p12, %p2766_p11 }
  0x1f   :  { %p2769_p0 = pnand %p2768_p13, %p2762_p10 }
  0x21   :  { %2772 = shalt.err (!%p2769_p0)
}
  0x22   :  { %55 = dma.hbm_to_vmem [thread:$0]  %s3321_s3, 512, %s50_s6, [#allocation10], %s2823_s23, %s2823_s23, %s2824_s24  }
  0x23   :  { %s2781_s1 = scalar_lea.vmem %s62_s8, 512  ;;  %p2786_p2 = scmp.lt.s32.totalorder %s62_s8, %s62_s8 }
  0x24   :  { %p2782_p1 = scmp.ne.s32.totalorder %s62_s8, %s2781_s1  ;;  %p2787_p3 = scmp.lt.s32.totalorder %s2781_s1, %s2781_s1 }
  0x26   :  { %p2788_p4 = por %p2787_p3, %p2786_p2 }
  0x28   :  { %p2789_p5 = pnand %p2788_p4, %p2782_p1 }
  0x2a   :  { %2792 = shalt.err (!%p2789_p5)
}
  0x2b   :  { %67 = dma.hbm_to_vmem [thread:$0]  %s3322_s4, 512, %s62_s8, [#allocation13], %s2823_s23, %s2823_s23, %s2824_s24  }
  0x2c   :  { %2813 = dma.done.wait [#allocation7], 1024  }
  0x2d   :  { %2814 = vsyncadd [#allocation7], 4294966272 }
  0x2e   :  { %2815 = dma.done.wait [#allocation10], 1536  }
  0x2f   :  { %2816 = vsyncadd [#allocation10], 4294965760 }
  0x30   :  { %2817 = dma.done.wait [#allocation13], 512  }
  0x31   :  { %2818 = vsyncadd [#allocation13], 4294966784  ;;  %vm86_vm0 = vcmask 261120   ;;  %v2827_v0 = vmov 0.0   ;;  %vm2828_vm1 = vmmov 0   ;;  %v2902_v1 = vld [vmem:[#allocation12 + $0x18] sm:$0xff] }
  0x32   :  { %2405 = vmatprep.subr.mxu1 %v2827_v0  ;;  %2394 = vmatprep.subr.mxu0 %v2827_v0  ;;  %89 = vst.msk [vmem:[#allocation4] sm:$0xff] %vm86_vm0, %v2827_v0  ;;  %87 = vst.msk [vmem:[#allocation2] sm:$0xff] %vm86_vm0, %v2827_v0  ;;  %v2904_v2 = vld [vmem:[#allocation12 + $0x10] sm:$0xff]  ;;  %v2906_v3 = vld [vmem:[#allocation11 + $0x18] sm:$0xff]  ;;  %s2829_s3 = smov 32   ;;  %v2830_v12 = vmov 0  }
  0x33   :  { %88 = vst.msk [vmem:[#allocation3] sm:$0xff] %vm86_vm0, %v2827_v0  ;;  %90 = vst.msk [vmem:[#allocation5] sm:$0xff] %vm86_vm0, %v2827_v0  ;;  %2413 = vmatprep.mubr.msk.f32.mxu1 %vm2828_vm1, %v2827_v0  ;;  %2402 = vmatprep.mubr.msk.f32.mxu0 %vm2828_vm1, %v2827_v0  ;;  %v2910_v4 = vld [vmem:[#allocation11 + $0x10] sm:$0xff]  ;;  %v2913_v5 = vld [vmem:[#allocation12 + $0x8] sm:$0xff]  ;;  %s2831_s4 = smov 64   ;;  %s2833_s15 = smov [#allocation14]  }
  0x34   :  { %2406 = vmatpush3.msra.mxu1 %v2902_v1  ;;  %2395 = vmatpush3.msra.mxu0 %v2906_v3  ;;  %v2916_v6 = vld [vmem:[#allocation11 + $0x8] sm:$0xff]  ;;  %v2921_v7 = vld [vmem:[#allocation12] sm:$0xff]  ;;  %v229_v13 = vld [vmem:[#allocation9 + $0x38] sm:$0xff]  ;;  %s2269_s16 = sshll.u32 %s2833_s15, 4  ;;  %s2270_s16 = int_to_ptr.vmem [resolvable:$true] %s2269_s16 }
  0x35   :  { %2407 = vmatprep.subr.mxu1 %v2827_v0  ;;  %2396 = vmatprep.subr.mxu0 %v2827_v0  ;;  %v2924_v8 = vld [vmem:[#allocation11] sm:$0xff]  ;;  %s2793_s17 = scalar_lea.vmem %s2270_s16, 128  ;;  %p2798_p7 = scmp.lt.s32.totalorder %s2270_s16, %s2270_s16 }
  0x36   :  { %2408 = vmatpush3.msra.mxu1 %v2904_v2  ;;  %2397 = vmatpush3.msra.mxu0 %v2910_v4  ;;  %v94_v14 = vld [vmem:[#allocation6] sm:$0xff]  ;;  %p2794_p6 = scmp.ne.s32.totalorder %s2270_s16, %s2793_s17  ;;  %p2799_p8 = scmp.lt.s32.totalorder %s2793_s17, %s2793_s17 }
  0x37   :  { %2409 = vmatprep.subr.mxu1 %v2827_v0  ;;  %2398 = vmatprep.subr.mxu0 %v2827_v0  ;;  %v2969_v23 = vld [vmem:[%s3318_s0] sm:$0xff]  ;;  %s2832_s0 = smov 96  }
  0x38   :  { %2410 = vmatpush3.msra.mxu1 %v2913_v5  ;;  %2399 = vmatpush3.msra.mxu0 %v2916_v6  ;;  %vm231_vm2 = vcmp.gt.s32.totalorder %v2969_v23, 7  ;;  %vm96_vm3 = vcmp.gt.s32.totalorder %v2969_v23, 0  ;;  %vm501_vm6 = vcmp.gt.s32.totalorder %v2969_v23, 6  ;;  %vm367_vm7 = vcmp.gt.s32.totalorder %v2969_v23, 1  ;;  %p2800_p9 = por %p2799_p8, %p2798_p7 }
  0x39   :  { %v2927_v9 = vld [vmem:[#allocation4] sm:$0xff]  ;;  %v2930_v10 = vld [vmem:[#allocation2] sm:$0xff]  ;;  %2411 = vmatprep.subr.mxu1 %v2827_v0  ;;  %2400 = vmatprep.subr.mxu0 %v2827_v0  ;;  %v2975_v25 = vsel %vm231_vm2, 1, %v2830_v12  ;;  %v2980_v26 = vsel %vm96_vm3, 1, %v2830_v12  ;;  %vm771_vm10 = vcmp.gt.s32.totalorder %v2969_v23, 5  ;;  %vm637_vm11 = vcmp.gt.s32.totalorder %v2969_v23, 2 }
  0x3a   :  { %v318_v11 = vld [vmem:[#allocation5] sm:$0xff]  ;;  %2412 = vmatpush3.msra.mxu1 %v2921_v7  ;;  %2401 = vmatpush3.msra.mxu0 %v2924_v8  ;;  %v184_v24 = vld [vmem:[#allocation3] sm:$0xff]  ;;  %vm1041_vm14 = vcmp.gt.s32.totalorder %v2969_v23, 4  ;;  %vm907_vm15 = vcmp.gt.s32.totalorder %v2969_v23, 3  ;;  %p2801_p10 = pnand %p2800_p9, %p2794_p6 }
  0x3b   :  { %2414 = vmatmul.mubr.msk.f32.vlgmr.msra.gmra.mxu1 %vm86_vm0, %v2927_v9  ;;  %2403 = vmatmul.mubr.msk.f32.vlgmr.msra.gmra.mxu0 %vm86_vm0, %v2930_v10 }
  0x3c   :  { %320 = vrot.lane.b32.xlu1 %v318_v11, %s2829_s3  ;;  %2427 = vmatprep.subr.mxu1 %v2827_v0 }
  0x3d   :  { %2428 = vmatpush3.msra.mxu1 %v2902_v1  ;;  %2416 = vmatprep.subr.mxu0 %v2827_v0 }
  0x3e   :  { %2429 = vmatprep.subr.mxu1 %v2827_v0  ;;  %2417 = vmatpush3.msra.mxu0 %v2906_v3 }
  0x3f   :  { %2430 = vmatpush3.msra.mxu1 %v2904_v2  ;;  %2435 = vmatprep.mubr.msk.f32.mxu1 %vm2828_vm1, %v2827_v0 }
  0x40   :  { %2431 = vmatprep.subr.mxu1 %v2827_v0  ;;  %2418 = vmatprep.subr.mxu0 %v2827_v0 }
  0x41   :  { %2432 = vmatpush3.msra.mxu1 %v2913_v5  ;;  %2419 = vmatpush3.msra.mxu0 %v2910_v4 }
  0x42   :  { %2433 = vmatprep.subr.mxu1 %v2827_v0  ;;  %2420 = vmatprep.subr.mxu0 %v2827_v0 }
  0x43   :  { %2434 = vmatpush3.msra.mxu1 %v2921_v7  ;;  %2421 = vmatpush3.msra.mxu0 %v2916_v6 }
  0x44   :  { %2422 = vmatprep.subr.mxu0 %v2827_v0  ;;  %2424 = vmatprep.mubr.msk.f32.mxu0 %vm2828_vm1, %v2827_v0 }
  0x45   :  { %2423 = vmatpush3.msra.mxu0 %v2924_v8  ;;  %2449 = vmatprep.subr.mxu1 %v2827_v0 }
  0x46   :  { %2438 = vmatprep.subr.mxu0 %v2827_v0  ;;  %2583 = vset.pattern.permute.xlu0 %v2830_v12 }
  0x47   :  { %2584 = vset.pattern.permute.xlu1 %v2830_v12 }
  0xae   :  { %v321_v39 = vpop.permute.xlu1 %320 }
  0xfb   :  { %v306_v15 = vpop.f32.mrf.mxu1  ;;  %v172_v16 = vpop.f32.mrf.mxu0 }
  0xfc   :  { %v310_v17 = vadd.f32 %v306_v15, %v229_v13  ;;  %v176_v18 = vadd.f32 %v172_v16, %v94_v14  ;;  %v3019_v15 = vsel %vm501_vm6, 1, %v2830_v12  ;;  %v499_v16 = vld [vmem:[#allocation9 + $0x30] sm:$0xff] }
  0xfd   :  { %v2415_v19 = vpop.f32.mrf.mxu1  ;;  %v2404_v20 = vpop.f32.mrf.mxu0 }
  0xfe   :  { %2585 = vtanh.f32 %v310_v17  ;;  %v2285_v27 = vmul.f32 -1.442695, %v310_v17  ;;  %v2283_v28 = vmul.f32 -1.442695, %v176_v18  ;;  %v365_v20 = vld [vmem:[#allocation6 + $0x8] sm:$0xff] }
  0xff   :  { %2587 = vtanh.f32 %v176_v18 }
 0x100   :  { %2589 = vpow2.f32 %v2285_v27 }
 0x101   :  { %2591 = vpow2.f32 %v2283_v28 }
 0x10b   :  { %v2586_v21 = vpop.eup %2585 }
 0x10c   :  { %325 = vrot.lane.b32.xlu0 %v2586_v21, %s2831_s4  ;;  %v2588_v22 = vpop.eup %2587 }
 0x10d   :  { %v2590_v29 = vpop.eup %2589 }
 0x10e   :  { %v2592_v30 = vpop.eup %2591  ;;  %v314_v31 = vadd.f32 1.0, %v2590_v29 }
 0x10f   :  { %v180_v32 = vadd.f32 1.0, %v2592_v30 }
 0x110   :  { %191 = vrot.lane.b32.xlu0 %v2588_v22, %s2831_s4  ;;  %2593 = vrcp.f32 %v314_v31 }
 0x111   :  { %2595 = vrcp.f32 %v180_v32 }
 0x114   :  { %186 = vrot.lane.b32.xlu0 %v184_v24, %s2829_s3 }
 0x118   :  { %342 = vperm.xlu0 %2583, %v2975_v25  }
 0x11c   :  { %208 = vperm.xlu0 %2583, %v2980_v26  }
 0x11d   :  { %v2594_v33 = vpop.eup %2593 }
 0x11e   :  { %v2596_v36 = vpop.eup %2595  ;;  %v323_v40 = vmul.f32 %v2594_v33, %v321_v39 }
 0x120   :  { %219 = vrot.lane.b32.xlu0 %v2930_v10, %s2832_s0 }
 0x17e   :  { %v326_v34 = vpop.permute.xlu0 %325 }
 0x17f   :  { %v328_v35 = vmul.f32 %v2594_v33, %v326_v34 }
 0x181   :  { %330 = vrot.lane.b32.xlu1 %v328_v35, %s2829_s3 }
 0x182   :  { %v192_v37 = vpop.permute.xlu0 %191 }
 0x183   :  { %v194_v38 = vmul.f32 %v2596_v36, %v192_v37 }
 0x185   :  { %196 = vrot.lane.b32.xlu1 %v194_v38, %s2829_s3 }
 0x186   :  { %v187_v43 = vpop.permute.xlu0 %186 }
 0x187   :  { %v189_v45 = vmul.f32 %v2596_v36, %v187_v43 }
 0x193   :  { %v343_v49 = vpop.permute.xlu0 %342 }
 0x194   :  { %vm344_vm4 = vcmp.eq.s32.totalorder %v343_v49, 1 }
 0x197   :  { %v209_v52 = vpop.permute.xlu0 %208 }
 0x198   :  { %vm210_vm5 = vcmp.eq.s32.totalorder %v209_v52, 1 }
 0x19b   :  { %v220_v56 = vpop.permute.xlu0 %219 }
 0x1f3   :  { %v331_v41 = vpop.permute.xlu1 %330 }
 0x1f4   :  { %v333_v42 = vadd.f32 %v331_v41, %v323_v40 }
 0x1f6   :  { %2597 = vtanh.f32 %v333_v42  ;;  %v345_v58 = vsel %vm344_vm4, %v333_v42, %v321_v39 }
 0x1f7   :  { %v197_v44 = vpop.permute.xlu1 %196 }
 0x1f8   :  { %v199_v46 = vadd.f32 %v197_v44, %v189_v45 }
 0x1fa   :  { %2599 = vtanh.f32 %v199_v46  ;;  %v211_v60 = vsel %vm210_vm5, %v199_v46, %v187_v43 }
 0x203   :  { %v2598_v47 = vpop.eup %2597 }
 0x204   :  { %336 = vrot.lane.b32.xlu1 %v2598_v47, %s2831_s4 }
 0x207   :  { %v2600_v48 = vpop.eup %2599 }
 0x208   :  { %353 = vrot.lane.b32.xlu1 %v2927_v9, %s2832_s0 }
 0x20c   :  { %202 = vrot.lane.b32.xlu1 %v2600_v48, %s2831_s4 }
 0x276   :  { %v337_v50 = vpop.permute.xlu1 %336 }
 0x277   :  { %v339_v51 = vmul.f32 %v2594_v33, %v337_v50  ;;  %v3039_v50 = vsel %vm367_vm7, 1, %v2830_v12 }
 0x27a   :  { %v354_v53 = vpop.permute.xlu1 %353 }
 0x27b   :  { %v356_v54 = vsel %vm344_vm4, %v339_v51, %v354_v53 }
 0x27c   :  { %358 = vrot.lane.b32.xlu1 %v356_v54, %s2829_s3 }
 0x27e   :  { %v203_v55 = vpop.permute.xlu1 %202 }
 0x27f   :  { %v205_v57 = vmul.f32 %v2596_v36, %v203_v55 }
 0x280   :  { %347 = vrot.lane.b32.xlu1 %v345_v58, %s2832_s0 }
 0x281   :  { %v222_v59 = vsel %vm210_vm5, %v205_v57, %v220_v56 }
 0x282   :  { %224 = vrot.lane.b32.xlu0 %v222_v59, %s2829_s3 }
 0x284   :  { %213 = vrot.lane.b32.xlu1 %v211_v60, %s2832_s0 }
 0x2ee   :  { %v359_v61 = vpop.permute.xlu1 %358 }
 0x2ef   :  { %361 = vst.msk [vmem:[#allocation4] sm:$0xff] %vm86_vm0, %v359_v61 }
 0x2f2   :  { %v348_v62 = vpop.permute.xlu1 %347 }
 0x2f3   :  { %350 = vst.msk [vmem:[#allocation5] sm:$0xff] %vm86_vm0, %v348_v62 }
 0x2f4   :  { %v225_v63 = vpop.permute.xlu0 %224 }
 0x2f5   :  { %227 = vst.msk [vmem:[#allocation2] sm:$0xff] %vm86_vm0, %v225_v63 }
 0x2f6   :  { %v214_v9 = vpop.permute.xlu1 %213  ;;  %v502_v10 = vld [vmem:[#allocation4] sm:$0xff] }
 0x2f7   :  { %216 = vst.msk [vmem:[#allocation3] sm:$0xff] %vm86_vm0, %v214_v9  ;;  %2436 = vmatmul.mubr.msk.f32.vlgmr.msra.gmra.mxu1 %vm86_vm0, %v502_v10 }
 0x2f8   :  { %2450 = vmatpush3.msra.mxu1 %v2902_v1  ;;  %2457 = vmatprep.mubr.msk.f32.mxu1 %vm2828_vm1, %v2827_v0 }
 0x2f9   :  { %2451 = vmatprep.subr.mxu1 %v2827_v0 }
 0x2fa   :  { %v588_v11 = vld [vmem:[#allocation5] sm:$0xff]  ;;  %2452 = vmatpush3.msra.mxu1 %v2904_v2 }
 0x2fb   :  { %590 = vrot.lane.b32.xlu1 %v588_v11, %s2829_s3  ;;  %2453 = vmatprep.subr.mxu1 %v2827_v0 }
 0x2fc   :  { %v3007_v13 = vld [vmem:[#allocation2] sm:$0xff]  ;;  %2454 = vmatpush3.msra.mxu1 %v2913_v5 }
 0x2fd   :  { %2425 = vmatmul.mubr.msk.f32.vlgmr.msra.gmra.mxu0 %vm86_vm0, %v3007_v13  ;;  %2455 = vmatprep.subr.mxu1 %v2827_v0 }
 0x2fe   :  { %v454_v14 = vld [vmem:[#allocation3] sm:$0xff]  ;;  %2456 = vmatpush3.msra.mxu1 %v2921_v7  ;;  %2439 = vmatpush3.msra.mxu0 %v2906_v3 }
 0x2ff   :  { %456 = vrot.lane.b32.xlu1 %v454_v14, %s2829_s3  ;;  %2440 = vmatprep.subr.mxu0 %v2827_v0 }
 0x300   :  { %2441 = vmatpush3.msra.mxu0 %v2910_v4  ;;  %2446 = vmatprep.mubr.msk.f32.mxu0 %vm2828_vm1, %v2827_v0 }
 0x301   :  { %2442 = vmatprep.subr.mxu0 %v2827_v0  ;;  %2471 = vmatprep.subr.mxu1 %v2827_v0 }
 0x302   :  { %2443 = vmatpush3.msra.mxu0 %v2916_v6 }
 0x303   :  { %612 = vperm.xlu1 %2584, %v3019_v15   ;;  %2444 = vmatprep.subr.mxu0 %v2827_v0 }
 0x304   :  { %2445 = vmatpush3.msra.mxu0 %v2924_v8 }
 0x305   :  { %2460 = vmatprep.subr.mxu0 %v2827_v0 }
 0x307   :  { %623 = vrot.lane.b32.xlu1 %v502_v10, %s2832_s0 }
 0x36d   :  { %v591_v41 = vpop.permute.xlu1 %590 }
 0x371   :  { %v457_v45 = vpop.permute.xlu1 %456 }
 0x37e   :  { %v613_v52 = vpop.permute.xlu1 %612 }
 0x37f   :  { %vm614_vm8 = vcmp.eq.s32.totalorder %v613_v52, 1 }
 0x382   :  { %v624_v55 = vpop.permute.xlu1 %623 }
 0x3b7   :  { %v576_v17 = vpop.f32.mrf.mxu1 }
 0x3b8   :  { %v580_v18 = vadd.f32 %v576_v17, %v499_v16 }
 0x3b9   :  { %v2437_v19 = vpop.f32.mrf.mxu1 }
 0x3ba   :  { %2601 = vtanh.f32 %v580_v18  ;;  %v2289_v29 = vmul.f32 -1.442695, %v580_v18  ;;  %v3068_v18 = vsel %vm771_vm10, 1, %v2830_v12 }
 0x3bd   :  { %v442_v21 = vpop.f32.mrf.mxu0 }
 0x3be   :  { %v446_v22 = vadd.f32 %v442_v21, %v365_v20  ;;  %v769_v20 = vld [vmem:[#allocation9 + $0x28] sm:$0xff] }
 0x3bf   :  { %v2426_v24 = vpop.f32.mrf.mxu0 }
 0x3c0   :  { %2603 = vtanh.f32 %v446_v22  ;;  %v2287_v30 = vmul.f32 -1.442695, %v446_v22 }
 0x3c1   :  { %2605 = vpow2.f32 %v2289_v29 }
 0x3c2   :  { %2607 = vpow2.f32 %v2287_v30 }
 0x3c7   :  { %v2602_v27 = vpop.eup %2601 }
 0x3c8   :  { %595 = vrot.lane.b32.xlu0 %v2602_v27, %s2831_s4  ;;  %v635_v27 = vld [vmem:[#allocation6 + $0x10] sm:$0xff] }
 0x3cd   :  { %v2604_v28 = vpop.eup %2603 }
 0x3ce   :  { %461 = vrot.lane.b32.xlu0 %v2604_v28, %s2831_s4  ;;  %v2606_v31 = vpop.eup %2605 }
 0x3cf   :  { %v584_v32 = vadd.f32 1.0, %v2606_v31  ;;  %v2608_v33 = vpop.eup %2607 }
 0x3d0   :  { %v450_v34 = vadd.f32 1.0, %v2608_v33 }
 0x3d1   :  { %2609 = vrcp.f32 %v584_v32 }
 0x3d2   :  { %2611 = vrcp.f32 %v450_v34 }
 0x3de   :  { %v2610_v35 = vpop.eup %2609 }
 0x3df   :  { %v2612_v38 = vpop.eup %2611  ;;  %v593_v42 = vmul.f32 %v2610_v35, %v591_v41 }
 0x3e0   :  { %v459_v46 = vmul.f32 %v2612_v38, %v457_v45 }
 0x43a   :  { %v596_v36 = vpop.permute.xlu0 %595 }
 0x43b   :  { %v598_v37 = vmul.f32 %v2610_v35, %v596_v36 }
 0x43d   :  { %600 = vrot.lane.b32.xlu0 %v598_v37, %s2829_s3 }
 0x440   :  { %v462_v39 = vpop.permute.xlu0 %461 }
 0x441   :  { %v464_v40 = vmul.f32 %v2612_v38, %v462_v39 }
 0x443   :  { %466 = vrot.lane.b32.xlu0 %v464_v40, %s2829_s3 }
 0x4af   :  { %v601_v43 = vpop.permute.xlu0 %600 }
 0x4b0   :  { %v603_v44 = vadd.f32 %v601_v43, %v593_v42 }
 0x4b2   :  { %2613 = vtanh.f32 %v603_v44  ;;  %v615_v57 = vsel %vm614_vm8, %v603_v44, %v591_v41 }
 0x4b5   :  { %v467_v47 = vpop.permute.xlu0 %466 }
 0x4b6   :  { %v469_v48 = vadd.f32 %v467_v47, %v459_v46 }
 0x4b8   :  { %2615 = vtanh.f32 %v469_v48 }
 0x4bf   :  { %v2614_v49 = vpop.eup %2613 }
 0x4c0   :  { %606 = vrot.lane.b32.xlu0 %v2614_v49, %s2831_s4 }
 0x4c4   :  { %478 = vperm.xlu0 %2583, %v3039_v50  }
 0x4c5   :  { %v2616_v51 = vpop.eup %2615 }
 0x4c6   :  { %472 = vrot.lane.b32.xlu1 %v2616_v51, %s2831_s4 }
 0x4c8   :  { %489 = vrot.lane.b32.xlu0 %v3007_v13, %s2832_s0 }
 0x532   :  { %v607_v53 = vpop.permute.xlu0 %606 }
 0x533   :  { %v609_v54 = vmul.f32 %v2610_v35, %v607_v53 }
 0x535   :  { %v626_v56 = vsel %vm614_vm8, %v609_v54, %v624_v55  ;;  %v3090_v55 = vsel %vm637_vm11, 1, %v2830_v12  ;;  %vm2261_vm11 = vcmask 523264  }
 0x536   :  { %628 = vrot.lane.b32.xlu1 %v626_v56, %s2829_s3 }
 0x538   :  { %v473_v58 = vpop.permute.xlu1 %472 }
 0x539   :  { %v475_v61 = vmul.f32 %v2612_v38, %v473_v58 }
 0x53a   :  { %617 = vrot.lane.b32.xlu1 %v615_v57, %s2832_s0 }
 0x53f   :  { %v479_v59 = vpop.permute.xlu0 %478 }
 0x540   :  { %vm480_vm9 = vcmp.eq.s32.totalorder %v479_v59, 1 }
 0x541   :  { %v481_v60 = vsel %vm480_vm9, %v469_v48, %v457_v45 }
 0x542   :  { %483 = vrot.lane.b32.xlu1 %v481_v60, %s2832_s0 }
 0x543   :  { %v490_v62 = vpop.permute.xlu0 %489 }
 0x544   :  { %v492_v63 = vsel %vm480_vm9, %v475_v61, %v490_v62 }
 0x545   :  { %494 = vrot.lane.b32.xlu0 %v492_v63, %s2829_s3 }
 0x5a8   :  { %v629_v9 = vpop.permute.xlu1 %628 }
 0x5a9   :  { %631 = vst.msk [vmem:[#allocation4] sm:$0xff] %vm86_vm0, %v629_v9 }
 0x5ac   :  { %v618_v10 = vpop.permute.xlu1 %617 }
 0x5ad   :  { %620 = vst.msk [vmem:[#allocation5] sm:$0xff] %vm86_vm0, %v618_v10 }
 0x5b0   :  { %v772_v11 = vld [vmem:[#allocation4] sm:$0xff] }
 0x5b1   :  { %2458 = vmatmul.mubr.msk.f32.vlgmr.msra.gmra.mxu1 %vm86_vm0, %v772_v11 }
 0x5b2   :  { %2472 = vmatpush3.msra.mxu1 %v2902_v1  ;;  %2479 = vmatprep.mubr.msk.f32.mxu1 %vm2828_vm1, %v2827_v0 }
 0x5b3   :  { %2473 = vmatprep.subr.mxu1 %v2827_v0 }
 0x5b4   :  { %v484_v13 = vpop.permute.xlu1 %483  ;;  %v858_v14 = vld [vmem:[#allocation5] sm:$0xff]  ;;  %2474 = vmatpush3.msra.mxu1 %v2904_v2 }
 0x5b5   :  { %486 = vst.msk [vmem:[#allocation3] sm:$0xff] %vm86_vm0, %v484_v13  ;;  %860 = vrot.lane.b32.xlu1 %v858_v14, %s2829_s3  ;;  %2475 = vmatprep.subr.mxu1 %v2827_v0 }
 0x5b6   :  { %2476 = vmatpush3.msra.mxu1 %v2913_v5 }
 0x5b7   :  { %v495_v16 = vpop.permute.xlu0 %494  ;;  %2477 = vmatprep.subr.mxu1 %v2827_v0 }
 0x5b8   :  { %497 = vst.msk [vmem:[#allocation2] sm:$0xff] %vm86_vm0, %v495_v16  ;;  %2478 = vmatpush3.msra.mxu1 %v2921_v7 }
 0x5b9   :  { %2493 = vmatprep.subr.mxu1 %v2827_v0 }
 0x5bc   :  { %v724_v17 = vld [vmem:[#allocation3] sm:$0xff] }
 0x5bd   :  { %726 = vrot.lane.b32.xlu1 %v724_v17, %s2829_s3 }
 0x5bf   :  { %v638_v19 = vld [vmem:[#allocation2] sm:$0xff] }
 0x5c0   :  { %2447 = vmatmul.mubr.msk.f32.vlgmr.msra.gmra.mxu0 %vm86_vm0, %v638_v19 }
 0x5c1   :  { %882 = vperm.xlu1 %2584, %v3068_v18   ;;  %2461 = vmatpush3.msra.mxu0 %v2906_v3 }
 0x5c2   :  { %2462 = vmatprep.subr.mxu0 %v2827_v0  ;;  %2468 = vmatprep.mubr.msk.f32.mxu0 %vm2828_vm1, %v2827_v0 }
 0x5c3   :  { %2463 = vmatpush3.msra.mxu0 %v2910_v4 }
 0x5c4   :  { %2464 = vmatprep.subr.mxu0 %v2827_v0 }
 0x5c5   :  { %893 = vrot.lane.b32.xlu1 %v772_v11, %s2832_s0  ;;  %2465 = vmatpush3.msra.mxu0 %v2916_v6 }
 0x5c6   :  { %2466 = vmatprep.subr.mxu0 %v2827_v0 }
 0x5c7   :  { %2467 = vmatpush3.msra.mxu0 %v2924_v8 }
 0x5c8   :  { %2482 = vmatprep.subr.mxu0 %v2827_v0 }
 0x627   :  { %v861_v45 = vpop.permute.xlu1 %860 }
 0x62f   :  { %v727_v49 = vpop.permute.xlu1 %726 }
 0x63c   :  { %v883_v57 = vpop.permute.xlu1 %882 }
 0x63d   :  { %vm884_vm12 = vcmp.eq.s32.totalorder %v883_v57, 1 }
 0x640   :  { %v894_v60 = vpop.permute.xlu1 %893 }
 0x671   :  { %v846_v21 = vpop.f32.mrf.mxu1 }
 0x672   :  { %v850_v22 = vadd.f32 %v846_v21, %v769_v20 }
 0x673   :  { %v2459_v24 = vpop.f32.mrf.mxu1 }
 0x674   :  { %2617 = vtanh.f32 %v850_v22  ;;  %v2293_v33 = vmul.f32 -1.442695, %v850_v22 }
 0x680   :  { %v712_v28 = vpop.f32.mrf.mxu0 }
 0x681   :  { %v2618_v29 = vpop.eup %2617  ;;  %v716_v30 = vadd.f32 %v712_v28, %v635_v27  ;;  %v905_v28 = vld [vmem:[#allocation6 + $0x18] sm:$0xff] }
 0x682   :  { %865 = vrot.lane.b32.xlu0 %v2618_v29, %s2831_s4  ;;  %v2448_v31 = vpop.f32.mrf.mxu0 }
 0x683   :  { %2619 = vtanh.f32 %v716_v30  ;;  %v2291_v34 = vmul.f32 -1.442695, %v716_v30 }
 0x684   :  { %2621 = vpow2.f32 %v2293_v33 }
 0x685   :  { %2623 = vpow2.f32 %v2291_v34 }
 0x690   :  { %v2620_v32 = vpop.eup %2619 }
 0x691   :  { %731 = vrot.lane.b32.xlu0 %v2620_v32, %s2831_s4  ;;  %v2622_v35 = vpop.eup %2621 }
 0x692   :  { %v854_v36 = vadd.f32 1.0, %v2622_v35  ;;  %v2624_v37 = vpop.eup %2623 }
 0x693   :  { %v720_v38 = vadd.f32 1.0, %v2624_v37 }
 0x694   :  { %2625 = vrcp.f32 %v854_v36 }
 0x695   :  { %2627 = vrcp.f32 %v720_v38 }
 0x6a1   :  { %v2626_v39 = vpop.eup %2625 }
 0x6a2   :  { %v2628_v42 = vpop.eup %2627  ;;  %v863_v46 = vmul.f32 %v2626_v39, %v861_v45 }
 0x6a3   :  { %v729_v51 = vmul.f32 %v2628_v42, %v727_v49 }
 0x6f4   :  { %v866_v40 = vpop.permute.xlu0 %865 }
 0x6f5   :  { %v868_v41 = vmul.f32 %v2626_v39, %v866_v40 }
 0x6f7   :  { %870 = vrot.lane.b32.xlu0 %v868_v41, %s2829_s3 }
 0x703   :  { %v732_v43 = vpop.permute.xlu0 %731 }
 0x704   :  { %v734_v44 = vmul.f32 %v2628_v42, %v732_v43 }
 0x706   :  { %736 = vrot.lane.b32.xlu0 %v734_v44, %s2829_s3 }
 0x769   :  { %v871_v47 = vpop.permute.xlu0 %870 }
 0x76a   :  { %v873_v48 = vadd.f32 %v871_v47, %v863_v46 }
 0x76c   :  { %2629 = vtanh.f32 %v873_v48  ;;  %v885_v62 = vsel %vm884_vm12, %v873_v48, %v861_v45 }
 0x778   :  { %v737_v52 = vpop.permute.xlu0 %736 }
 0x779   :  { %v2630_v53 = vpop.eup %2629  ;;  %v739_v54 = vadd.f32 %v737_v52, %v729_v51 }
 0x77a   :  { %876 = vrot.lane.b32.xlu0 %v2630_v53, %s2831_s4  ;;  %v1016_v53 = vsel %vm907_vm15, 1, %v2830_v12 }
 0x77b   :  { %2631 = vtanh.f32 %v739_v54 }
 0x77e   :  { %748 = vperm.xlu0 %2583, %v3090_v55  }
 0x782   :  { %759 = vrot.lane.b32.xlu0 %v638_v19, %s2832_s0 }
 0x788   :  { %v2632_v56 = vpop.eup %2631 }
 0x789   :  { %742 = vrot.lane.b32.xlu1 %v2632_v56, %s2831_s4 }
 0x7ec   :  { %v877_v58 = vpop.permute.xlu0 %876 }
 0x7ed   :  { %v879_v59 = vmul.f32 %v2626_v39, %v877_v58 }
 0x7ef   :  { %v896_v61 = vsel %vm884_vm12, %v879_v59, %v894_v60 }
 0x7f0   :  { %898 = vrot.lane.b32.xlu1 %v896_v61, %s2829_s3 }
 0x7f4   :  { %887 = vrot.lane.b32.xlu1 %v885_v62, %s2832_s0 }
 0x7f9   :  { %v749_v63 = vpop.permute.xlu0 %748 }
 0x7fa   :  { %vm750_vm13 = vcmp.eq.s32.totalorder %v749_v63, 1 }
 0x7fb   :  { %v743_v9 = vpop.permute.xlu1 %742  ;;  %v751_v10 = vsel %vm750_vm13, %v739_v54, %v727_v49 }
 0x7fc   :  { %v745_v11 = vmul.f32 %v2628_v42, %v743_v9  ;;  %753 = vrot.lane.b32.xlu1 %v751_v10, %s2832_s0 }
 0x7fd   :  { %v760_v13 = vpop.permute.xlu0 %759 }
 0x7fe   :  { %v762_v14 = vsel %vm750_vm13, %v745_v11, %v760_v13 }
 0x7ff   :  { %764 = vrot.lane.b32.xlu0 %v762_v14, %s2829_s3 }
 0x862   :  { %v899_v16 = vpop.permute.xlu1 %898 }
 0x863   :  { %901 = vst.msk [vmem:[#allocation4] sm:$0xff] %vm86_vm0, %v899_v16 }
 0x866   :  { %v888_v17 = vpop.permute.xlu1 %887 }
 0x867   :  { %890 = vst.msk [vmem:[#allocation5] sm:$0xff] %vm86_vm0, %v888_v17 }
 0x86a   :  { %v1042_v19 = vld [vmem:[#allocation4] sm:$0xff] }
 0x86b   :  { %2480 = vmatmul.mubr.msk.f32.vlgmr.msra.gmra.mxu1 %vm86_vm0, %v1042_v19 }
 0x86c   :  { %2494 = vmatpush3.msra.mxu1 %v2902_v1  ;;  %2501 = vmatprep.mubr.msk.f32.mxu1 %vm2828_vm1, %v2827_v0 }
 0x86d   :  { %2495 = vmatprep.subr.mxu1 %v2827_v0 }
 0x86e   :  { %v754_v20 = vpop.permute.xlu1 %753  ;;  %v1128_v21 = vld [vmem:[#allocation5] sm:$0xff]  ;;  %2496 = vmatpush3.msra.mxu1 %v2904_v2  ;;  %v3118_v2 = vsel %vm1041_vm14, 1, %v2830_v12 }
 0x86f   :  { %756 = vst.msk [vmem:[#allocation3] sm:$0xff] %vm86_vm0, %v754_v20  ;;  %1130 = vrot.lane.b32.xlu1 %v1128_v21, %s2829_s3  ;;  %2497 = vmatprep.subr.mxu1 %v2827_v0 }
 0x870   :  { %2498 = vmatpush3.msra.mxu1 %v2913_v5 }
 0x871   :  { %v765_v22 = vpop.permute.xlu0 %764  ;;  %2499 = vmatprep.subr.mxu1 %v2827_v0 }
 0x872   :  { %767 = vst.msk [vmem:[#allocation2] sm:$0xff] %vm86_vm0, %v765_v22  ;;  %2500 = vmatpush3.msra.mxu1 %v2921_v7  ;;  %v1309_v22 = vld [vmem:[#allocation9 + $0x18] sm:$0xff] }
 0x873   :  { %2515 = vmatprep.subr.mxu1 %v2827_v0 }
 0x876   :  { %v994_v1 = vld [vmem:[#allocation3] sm:$0xff] }
 0x877   :  { %996 = vrot.lane.b32.xlu1 %v994_v1, %s2829_s3 }
 0x879   :  { %v908_v24 = vld [vmem:[#allocation2] sm:$0xff] }
 0x87a   :  { %2469 = vmatmul.mubr.msk.f32.vlgmr.msra.gmra.mxu0 %vm86_vm0, %v908_v24 }
 0x87b   :  { %1152 = vperm.xlu1 %2584, %v3118_v2   ;;  %2483 = vmatpush3.msra.mxu0 %v2906_v3  ;;  %v1039_v3 = vld [vmem:[#allocation9 + $0x20] sm:$0xff] }
 0x87c   :  { %2484 = vmatprep.subr.mxu0 %v2827_v0  ;;  %2490 = vmatprep.mubr.msk.f32.mxu0 %vm2828_vm1, %v2827_v0 }
 0x87d   :  { %2485 = vmatpush3.msra.mxu0 %v2910_v4 }
 0x87e   :  { %2486 = vmatprep.subr.mxu0 %v2827_v0 }
 0x87f   :  { %1163 = vrot.lane.b32.xlu1 %v1042_v19, %s2832_s0  ;;  %2487 = vmatpush3.msra.mxu0 %v2916_v6 }
 0x880   :  { %2488 = vmatprep.subr.mxu0 %v2827_v0 }
 0x881   :  { %2489 = vmatpush3.msra.mxu0 %v2924_v8 }
 0x882   :  { %2504 = vmatprep.subr.mxu0 %v2827_v0 }
 0x8e1   :  { %v1131_v43 = vpop.permute.xlu1 %1130 }
 0x8e9   :  { %v997_v47 = vpop.permute.xlu1 %996 }
 0x8f6   :  { %v1153_v56 = vpop.permute.xlu1 %1152 }
 0x8f7   :  { %vm1154_vm2 = vcmp.eq.s32.totalorder %v1153_v56, 1 }
 0x8fa   :  { %v1164_v59 = vpop.permute.xlu1 %1163 }
 0x92b   :  { %v1116_v5 = vpop.f32.mrf.mxu1 }
 0x92c   :  { %v1120_v7 = vadd.f32 %v1116_v5, %v1039_v3  ;;  %v1175_v5 = vld [vmem:[#allocation6 + $0x20] sm:$0xff] }
 0x92d   :  { %v2481_v27 = vpop.f32.mrf.mxu1 }
 0x92e   :  { %2633 = vtanh.f32 %v1120_v7  ;;  %v2297_v32 = vmul.f32 -1.442695, %v1120_v7 }
 0x93a   :  { %v982_v29 = vpop.f32.mrf.mxu0 }
 0x93b   :  { %v2634_v4 = vpop.eup %2633  ;;  %v986_v30 = vadd.f32 %v982_v29, %v905_v28 }
 0x93c   :  { %1135 = vrot.lane.b32.xlu0 %v2634_v4, %s2831_s4  ;;  %v2470_v31 = vpop.f32.mrf.mxu0 }
 0x93d   :  { %2635 = vtanh.f32 %v986_v30  ;;  %v2295_v8 = vmul.f32 -1.442695, %v986_v30 }
 0x93e   :  { %2637 = vpow2.f32 %v2297_v32 }
 0x93f   :  { %2639 = vpow2.f32 %v2295_v8 }
 0x94a   :  { %v2636_v6 = vpop.eup %2635 }
 0x94b   :  { %1001 = vrot.lane.b32.xlu0 %v2636_v6, %s2831_s4  ;;  %v2638_v33 = vpop.eup %2637 }
 0x94c   :  { %v1124_v34 = vadd.f32 1.0, %v2638_v33  ;;  %v2640_v35 = vpop.eup %2639 }
 0x94d   :  { %v990_v36 = vadd.f32 1.0, %v2640_v35 }
 0x94e   :  { %2641 = vrcp.f32 %v1124_v34 }
 0x94f   :  { %2643 = vrcp.f32 %v990_v36 }
 0x95b   :  { %v2642_v37 = vpop.eup %2641 }
 0x95c   :  { %v2644_v40 = vpop.eup %2643  ;;  %v1133_v44 = vmul.f32 %v2642_v37, %v1131_v43 }
 0x95d   :  { %v999_v48 = vmul.f32 %v2644_v40, %v997_v47 }
 0x9ae   :  { %v1136_v38 = vpop.permute.xlu0 %1135 }
 0x9af   :  { %v1138_v39 = vmul.f32 %v2642_v37, %v1136_v38 }
 0x9b1   :  { %1140 = vrot.lane.b32.xlu0 %v1138_v39, %s2829_s3 }
 0x9bd   :  { %v1002_v41 = vpop.permute.xlu0 %1001 }
 0x9be   :  { %v1004_v42 = vmul.f32 %v2644_v40, %v1002_v41 }
 0x9c0   :  { %1006 = vrot.lane.b32.xlu0 %v1004_v42, %s2829_s3 }
 0xa23   :  { %v1141_v45 = vpop.permute.xlu0 %1140 }
 0xa24   :  { %v1143_v46 = vadd.f32 %v1141_v45, %v1133_v44 }
 0xa26   :  { %2645 = vtanh.f32 %v1143_v46  ;;  %v1155_v23 = vsel %vm1154_vm2, %v1143_v46, %v1131_v43 }
 0xa32   :  { %v1007_v49 = vpop.permute.xlu0 %1006 }
 0xa33   :  { %v2646_v51 = vpop.eup %2645  ;;  %v1009_v52 = vadd.f32 %v1007_v49, %v999_v48 }
 0xa34   :  { %1146 = vrot.lane.b32.xlu0 %v2646_v51, %s2831_s4  ;;  %v3167_v51 = vld [vmem:[#allocation12 + $0x18] sm:$0xff] }
 0xa35   :  { %2647 = vtanh.f32 %v1009_v52 }
 0xa38   :  { %1018 = vperm.xlu0 %2583, %v1016_v53  }
 0xa3c   :  { %1029 = vrot.lane.b32.xlu0 %v908_v24, %s2832_s0 }
 0xa42   :  { %v2648_v54 = vpop.eup %2647 }
 0xa43   :  { %1012 = vrot.lane.b32.xlu1 %v2648_v54, %s2831_s4 }
 0xaa6   :  { %v1147_v57 = vpop.permute.xlu0 %1146 }
 0xaa7   :  { %v1149_v58 = vmul.f32 %v2642_v37, %v1147_v57 }
 0xaa9   :  { %v1166_v60 = vsel %vm1154_vm2, %v1149_v58, %v1164_v59 }
 0xaaa   :  { %1168 = vrot.lane.b32.xlu1 %v1166_v60, %s2829_s3  ;;  %v3184_v60 = vld [vmem:[#allocation11 + $0x18] sm:$0xff] }
 0xaae   :  { %1157 = vrot.lane.b32.xlu1 %v1155_v23, %s2832_s0  ;;  %v3186_v23 = vld [vmem:[#allocation11 + $0x10] sm:$0xff] }
 0xab3   :  { %v1019_v61 = vpop.permute.xlu0 %1018 }
 0xab4   :  { %vm1020_vm3 = vcmp.eq.s32.totalorder %v1019_v61, 1 }
 0xab5   :  { %v1013_v12 = vpop.permute.xlu1 %1012  ;;  %v1021_v62 = vsel %vm1020_vm3, %v1009_v52, %v997_v47  ;;  %v3169_v52 = vld [vmem:[#allocation12 + $0x10] sm:$0xff] }
 0xab6   :  { %v1015_v63 = vmul.f32 %v2644_v40, %v1013_v12  ;;  %1023 = vrot.lane.b32.xlu1 %v1021_v62, %s2832_s0  ;;  %v3191_v12 = vld [vmem:[#allocation11 + $0x8] sm:$0xff]  ;;  %v3196_v62 = vld [vmem:[#allocation11] sm:$0xff] }
 0xab7   :  { %v1030_v9 = vpop.permute.xlu0 %1029 }
 0xab8   :  { %v1032_v10 = vsel %vm1020_vm3, %v1015_v63, %v1030_v9 }
 0xab9   :  { %1034 = vrot.lane.b32.xlu0 %v1032_v10, %s2829_s3 }
 0xb1c   :  { %v1169_v11 = vpop.permute.xlu1 %1168 }
 0xb1d   :  { %1171 = vst.msk [vmem:[#allocation4] sm:$0xff] %vm86_vm0, %v1169_v11 }
 0xb20   :  { %v1158_v13 = vpop.permute.xlu1 %1157 }
 0xb21   :  { %1160 = vst.msk [vmem:[#allocation5] sm:$0xff] %vm86_vm0, %v1158_v13 }
 0xb24   :  { %v1312_v14 = vld [vmem:[#allocation4] sm:$0xff] }
 0xb25   :  { %2502 = vmatmul.mubr.msk.f32.vlgmr.msra.gmra.mxu1 %vm86_vm0, %v1312_v14 }
 0xb26   :  { %2523 = vmatprep.mubr.msk.f32.mxu1 %vm2828_vm1, %v2827_v0  ;;  %2516 = vmatpush3.msra.mxu1 %v3167_v51 }
 0xb27   :  { %2517 = vmatprep.subr.mxu1 %v2827_v0 }
 0xb28   :  { %v1024_v16 = vpop.permute.xlu1 %1023  ;;  %v1398_v17 = vld [vmem:[#allocation5] sm:$0xff]  ;;  %2518 = vmatpush3.msra.mxu1 %v3169_v52 }
 0xb29   :  { %1026 = vst.msk [vmem:[#allocation3] sm:$0xff] %vm86_vm0, %v1024_v16  ;;  %1400 = vrot.lane.b32.xlu1 %v1398_v17, %s2829_s3  ;;  %2519 = vmatprep.subr.mxu1 %v2827_v0 }
 0xb2b   :  { %v1035_v19 = vpop.permute.xlu0 %1034 }
 0xb2c   :  { %1037 = vst.msk [vmem:[#allocation2] sm:$0xff] %vm86_vm0, %v1035_v19 }
 0xb30   :  { %v1264_v20 = vld [vmem:[#allocation3] sm:$0xff] }
 0xb31   :  { %1266 = vrot.lane.b32.xlu1 %v1264_v20, %s2829_s3 }
 0xb33   :  { %v1178_v21 = vld [vmem:[#allocation2] sm:$0xff] }
 0xb34   :  { %2491 = vmatmul.mubr.msk.f32.vlgmr.msra.gmra.mxu0 %vm86_vm0, %v1178_v21 }
 0xb35   :  { %1422 = vperm.xlu1 %2584, %v1016_v53   ;;  %2512 = vmatprep.mubr.msk.f32.mxu0 %vm2828_vm1, %v2827_v0  ;;  %v3175_v53 = vld [vmem:[#allocation12 + $0x8] sm:$0xff] }
 0xb36   :  { %2520 = vmatpush3.msra.mxu1 %v3175_v53  ;;  %2505 = vmatpush3.msra.mxu0 %v3184_v60 }
 0xb37   :  { %2521 = vmatprep.subr.mxu1 %v2827_v0  ;;  %2506 = vmatprep.subr.mxu0 %v2827_v0 }
 0xb38   :  { %2507 = vmatpush3.msra.mxu0 %v3186_v23 }
 0xb39   :  { %1433 = vrot.lane.b32.xlu1 %v1312_v14, %s2832_s0  ;;  %2508 = vmatprep.subr.mxu0 %v2827_v0 }
 0xb3a   :  { %2509 = vmatpush3.msra.mxu0 %v3191_v12 }
 0xb3b   :  { %2510 = vmatprep.subr.mxu0 %v2827_v0 }
 0xb3c   :  { %2511 = vmatpush3.msra.mxu0 %v3196_v62 }
 0xb3d   :  { %2526 = vmatprep.subr.mxu0 %v2827_v0 }
 0xb9b   :  { %v1401_v40 = vpop.permute.xlu1 %1400 }
 0xba3   :  { %v1267_v44 = vpop.permute.xlu1 %1266 }
 0xbb0   :  { %v1423_v54 = vpop.permute.xlu1 %1422 }
 0xbb1   :  { %vm1424_vm4 = vcmp.eq.s32.totalorder %v1423_v54, 1 }
 0xbb4   :  { %v1434_v58 = vpop.permute.xlu1 %1433 }
 0xbe5   :  { %v1386_v1 = vpop.f32.mrf.mxu1 }
 0xbe6   :  { %v1390_v24 = vadd.f32 %v1386_v1, %v1309_v22 }
 0xbe7   :  { %v2503_v3 = vpop.f32.mrf.mxu1 }
 0xbe8   :  { %2649 = vtanh.f32 %v1390_v24  ;;  %v2301_v30 = vmul.f32 -1.442695, %v1390_v24 }
 0xbf4   :  { %v1252_v7 = vpop.f32.mrf.mxu0 }
 0xbf5   :  { %v2650_v27 = vpop.eup %2649  ;;  %v1256_v28 = vadd.f32 %v1252_v7, %v1175_v5 }
 0xbf6   :  { %1405 = vrot.lane.b32.xlu0 %v2650_v27, %s2831_s4  ;;  %v2492_v29 = vpop.f32.mrf.mxu0  ;;  %v1445_v27 = vld [vmem:[#allocation6 + $0x28] sm:$0xff] }
 0xbf7   :  { %2651 = vtanh.f32 %v1256_v28  ;;  %v2299_v31 = vmul.f32 -1.442695, %v1256_v28 }
 0xbf8   :  { %2653 = vpow2.f32 %v2301_v30 }
 0xbf9   :  { %2655 = vpow2.f32 %v2299_v31 }
 0xc04   :  { %v2652_v4 = vpop.eup %2651 }
 0xc05   :  { %1271 = vrot.lane.b32.xlu0 %v2652_v4, %s2831_s4  ;;  %v2654_v6 = vpop.eup %2653 }
 0xc06   :  { %v1394_v32 = vadd.f32 1.0, %v2654_v6  ;;  %v2656_v8 = vpop.eup %2655 }
 0xc07   :  { %v1260_v33 = vadd.f32 1.0, %v2656_v8 }
 0xc08   :  { %2657 = vrcp.f32 %v1394_v32 }
 0xc09   :  { %2659 = vrcp.f32 %v1260_v33 }
 0xc15   :  { %v2658_v34 = vpop.eup %2657 }
 0xc16   :  { %v2660_v37 = vpop.eup %2659  ;;  %v1403_v41 = vmul.f32 %v2658_v34, %v1401_v40 }
 0xc17   :  { %v1269_v45 = vmul.f32 %v2660_v37, %v1267_v44 }
 0xc68   :  { %v1406_v35 = vpop.permute.xlu0 %1405 }
 0xc69   :  { %v1408_v36 = vmul.f32 %v2658_v34, %v1406_v35 }
 0xc6b   :  { %1410 = vrot.lane.b32.xlu0 %v1408_v36, %s2829_s3 }
 0xc77   :  { %v1272_v38 = vpop.permute.xlu0 %1271 }
 0xc78   :  { %v1274_v39 = vmul.f32 %v2660_v37, %v1272_v38 }
 0xc7a   :  { %1276 = vrot.lane.b32.xlu0 %v1274_v39, %s2829_s3 }
 0xcdd   :  { %v1411_v42 = vpop.permute.xlu0 %1410 }
 0xcde   :  { %v1413_v43 = vadd.f32 %v1411_v42, %v1403_v41 }
 0xce0   :  { %2661 = vtanh.f32 %v1413_v43  ;;  %v1425_v61 = vsel %vm1424_vm4, %v1413_v43, %v1401_v40 }
 0xcec   :  { %v1277_v46 = vpop.permute.xlu0 %1276 }
 0xced   :  { %v2662_v47 = vpop.eup %2661  ;;  %v1279_v48 = vadd.f32 %v1277_v46, %v1269_v45 }
 0xcee   :  { %1416 = vrot.lane.b32.xlu0 %v2662_v47, %s2831_s4 }
 0xcef   :  { %2663 = vtanh.f32 %v1279_v48 }
 0xcf2   :  { %1288 = vperm.xlu0 %2583, %v3118_v2   ;;  %v3177_v2 = vld [vmem:[#allocation12] sm:$0xff] }
 0xcf3   :  { %2522 = vmatpush3.msra.mxu1 %v3177_v2 }
 0xcf4   :  { %2537 = vmatprep.subr.mxu1 %v2827_v0 }
 0xcf6   :  { %1299 = vrot.lane.b32.xlu0 %v1178_v21, %s2832_s0 }
 0xcfc   :  { %v2664_v49 = vpop.eup %2663 }
 0xcfd   :  { %1282 = vrot.lane.b32.xlu1 %v2664_v49, %s2831_s4 }
 0xd60   :  { %v1417_v56 = vpop.permute.xlu0 %1416 }
 0xd61   :  { %v1419_v57 = vmul.f32 %v2658_v34, %v1417_v56 }
 0xd63   :  { %v1436_v59 = vsel %vm1424_vm4, %v1419_v57, %v1434_v58 }
 0xd64   :  { %1438 = vrot.lane.b32.xlu1 %v1436_v59, %s2829_s3 }
 0xd68   :  { %1427 = vrot.lane.b32.xlu1 %v1425_v61, %s2832_s0 }
 0xd6d   :  { %v1289_v63 = vpop.permute.xlu0 %1288 }
 0xd6e   :  { %vm1290_vm5 = vcmp.eq.s32.totalorder %v1289_v63, 1 }
 0xd6f   :  { %v1283_v9 = vpop.permute.xlu1 %1282  ;;  %v1291_v10 = vsel %vm1290_vm5, %v1279_v48, %v1267_v44 }
 0xd70   :  { %v1285_v11 = vmul.f32 %v2660_v37, %v1283_v9  ;;  %1293 = vrot.lane.b32.xlu1 %v1291_v10, %s2832_s0 }
 0xd71   :  { %v1300_v13 = vpop.permute.xlu0 %1299 }
 0xd72   :  { %v1302_v14 = vsel %vm1290_vm5, %v1285_v11, %v1300_v13 }
 0xd73   :  { %1304 = vrot.lane.b32.xlu0 %v1302_v14, %s2829_s3 }
 0xdd6   :  { %v1439_v16 = vpop.permute.xlu1 %1438 }
 0xdd7   :  { %1441 = vst.msk [vmem:[#allocation4] sm:$0xff] %vm86_vm0, %v1439_v16 }
 0xdda   :  { %v1428_v17 = vpop.permute.xlu1 %1427 }
 0xddb   :  { %1430 = vst.msk [vmem:[#allocation5] sm:$0xff] %vm86_vm0, %v1428_v17 }
 0xdde   :  { %v1582_v19 = vld [vmem:[#allocation4] sm:$0xff] }
 0xddf   :  { %2524 = vmatmul.mubr.msk.f32.vlgmr.msra.gmra.mxu1 %vm86_vm0, %v1582_v19 }
 0xde0   :  { %2538 = vmatpush3.msra.mxu1 %v3167_v51  ;;  %2545 = vmatprep.mubr.msk.f32.mxu1 %vm2828_vm1, %v2827_v0 }
 0xde1   :  { %2539 = vmatprep.subr.mxu1 %v2827_v0 }
 0xde2   :  { %v1294_v20 = vpop.permute.xlu1 %1293  ;;  %v1668_v21 = vld [vmem:[#allocation5] sm:$0xff]  ;;  %2540 = vmatpush3.msra.mxu1 %v3169_v52 }
 0xde3   :  { %1296 = vst.msk [vmem:[#allocation3] sm:$0xff] %vm86_vm0, %v1294_v20  ;;  %1670 = vrot.lane.b32.xlu1 %v1668_v21, %s2829_s3  ;;  %2541 = vmatprep.subr.mxu1 %v2827_v0 }
 0xde4   :  { %2542 = vmatpush3.msra.mxu1 %v3175_v53 }
 0xde5   :  { %v1305_v22 = vpop.permute.xlu0 %1304  ;;  %2543 = vmatprep.subr.mxu1 %v2827_v0 }
 0xde6   :  { %1307 = vst.msk [vmem:[#allocation2] sm:$0xff] %vm86_vm0, %v1305_v22  ;;  %2544 = vmatpush3.msra.mxu1 %v3177_v2 }
 0xde7   :  { %2559 = vmatprep.subr.mxu1 %v2827_v0 }
 0xdea   :  { %v1534_v1 = vld [vmem:[#allocation3] sm:$0xff] }
 0xdeb   :  { %1536 = vrot.lane.b32.xlu1 %v1534_v1, %s2829_s3 }
 0xded   :  { %v1448_v24 = vld [vmem:[#allocation2] sm:$0xff] }
 0xdee   :  { %2513 = vmatmul.mubr.msk.f32.vlgmr.msra.gmra.mxu0 %vm86_vm0, %v1448_v24 }
 0xdef   :  { %1692 = vperm.xlu1 %2584, %v3090_v55   ;;  %2527 = vmatpush3.msra.mxu0 %v3184_v60  ;;  %v1579_v55 = vld [vmem:[#allocation9 + $0x10] sm:$0xff] }
 0xdf0   :  { %2528 = vmatprep.subr.mxu0 %v2827_v0  ;;  %2534 = vmatprep.mubr.msk.f32.mxu0 %vm2828_vm1, %v2827_v0 }
 0xdf1   :  { %2529 = vmatpush3.msra.mxu0 %v3186_v23 }
 0xdf2   :  { %2530 = vmatprep.subr.mxu0 %v2827_v0 }
 0xdf3   :  { %1703 = vrot.lane.b32.xlu1 %v1582_v19, %s2832_s0  ;;  %2531 = vmatpush3.msra.mxu0 %v3191_v12 }
 0xdf4   :  { %2532 = vmatprep.subr.mxu0 %v2827_v0 }
 0xdf5   :  { %2533 = vmatpush3.msra.mxu0 %v3196_v62 }
 0xdf6   :  { %2548 = vmatprep.subr.mxu0 %v2827_v0 }
 0xe55   :  { %v1671_v42 = vpop.permute.xlu1 %1670 }
 0xe5d   :  { %v1537_v46 = vpop.permute.xlu1 %1536 }
 0xe6a   :  { %v1693_v57 = vpop.permute.xlu1 %1692 }
 0xe6b   :  { %vm1694_vm6 = vcmp.eq.s32.totalorder %v1693_v57, 1 }
 0xe6e   :  { %v1704_v61 = vpop.permute.xlu1 %1703 }
 0xe9f   :  { %v1656_v3 = vpop.f32.mrf.mxu1 }
 0xea0   :  { %v1660_v5 = vadd.f32 %v1656_v3, %v1579_v55 }
 0xea1   :  { %v2525_v7 = vpop.f32.mrf.mxu1 }
 0xea2   :  { %2665 = vtanh.f32 %v1660_v5  ;;  %v2305_v6 = vmul.f32 -1.442695, %v1660_v5 }
 0xeae   :  { %v1522_v28 = vpop.f32.mrf.mxu0 }
 0xeaf   :  { %v2666_v29 = vpop.eup %2665  ;;  %v1526_v4 = vadd.f32 %v1522_v28, %v1445_v27 }
 0xeb0   :  { %1675 = vrot.lane.b32.xlu0 %v2666_v29, %s2831_s4  ;;  %v2514_v30 = vpop.f32.mrf.mxu0 }
 0xeb1   :  { %2667 = vtanh.f32 %v1526_v4  ;;  %v2303_v32 = vmul.f32 -1.442695, %v1526_v4 }
 0xeb2   :  { %2669 = vpow2.f32 %v2305_v6 }
 0xeb3   :  { %2671 = vpow2.f32 %v2303_v32 }
 0xebe   :  { %v2668_v31 = vpop.eup %2667 }
 0xebf   :  { %1541 = vrot.lane.b32.xlu0 %v2668_v31, %s2831_s4  ;;  %v2670_v8 = vpop.eup %2669 }
 0xec0   :  { %v1664_v33 = vadd.f32 1.0, %v2670_v8  ;;  %v2672_v34 = vpop.eup %2671 }
 0xec1   :  { %v1530_v35 = vadd.f32 1.0, %v2672_v34 }
 0xec2   :  { %2673 = vrcp.f32 %v1664_v33 }
 0xec3   :  { %2675 = vrcp.f32 %v1530_v35 }
 0xecf   :  { %v2674_v36 = vpop.eup %2673 }
 0xed0   :  { %v2676_v39 = vpop.eup %2675  ;;  %v1673_v43 = vmul.f32 %v2674_v36, %v1671_v42 }
 0xed1   :  { %v1539_v47 = vmul.f32 %v2676_v39, %v1537_v46 }
 0xf22   :  { %v1676_v37 = vpop.permute.xlu0 %1675 }
 0xf23   :  { %v1678_v38 = vmul.f32 %v2674_v36, %v1676_v37 }
 0xf25   :  { %1680 = vrot.lane.b32.xlu0 %v1678_v38, %s2829_s3 }
 0xf31   :  { %v1542_v40 = vpop.permute.xlu0 %1541 }
 0xf32   :  { %v1544_v41 = vmul.f32 %v2676_v39, %v1542_v40 }
 0xf34   :  { %1546 = vrot.lane.b32.xlu0 %v1544_v41, %s2829_s3 }
 0xf97   :  { %v1681_v44 = vpop.permute.xlu0 %1680 }
 0xf98   :  { %v1683_v45 = vadd.f32 %v1681_v44, %v1673_v43 }
 0xf9a   :  { %2677 = vtanh.f32 %v1683_v45  ;;  %v1695_v9 = vsel %vm1694_vm6, %v1683_v45, %v1671_v42 }
 0xfa6   :  { %v1547_v48 = vpop.permute.xlu0 %1546 }
 0xfa7   :  { %v2678_v49 = vpop.eup %2677  ;;  %v1549_v54 = vadd.f32 %v1547_v48, %v1539_v47 }
 0xfa8   :  { %1686 = vrot.lane.b32.xlu0 %v2678_v49, %s2831_s4 }
 0xfa9   :  { %2679 = vtanh.f32 %v1549_v54 }
 0xfac   :  { %1558 = vperm.xlu0 %2583, %v3068_v18  }
 0xfb0   :  { %1569 = vrot.lane.b32.xlu0 %v1448_v24, %s2832_s0 }
 0xfb6   :  { %v2680_v56 = vpop.eup %2679 }
 0xfb7   :  { %1552 = vrot.lane.b32.xlu1 %v2680_v56, %s2831_s4 }
0x101a   :  { %v1687_v58 = vpop.permute.xlu0 %1686 }
0x101b   :  { %v1689_v59 = vmul.f32 %v2674_v36, %v1687_v58 }
0x101d   :  { %v1706_v63 = vsel %vm1694_vm6, %v1689_v59, %v1704_v61 }
0x101e   :  { %1708 = vrot.lane.b32.xlu1 %v1706_v63, %s2829_s3 }
0x1022   :  { %1697 = vrot.lane.b32.xlu1 %v1695_v9, %s2832_s0 }
0x1027   :  { %v1559_v10 = vpop.permute.xlu0 %1558 }
0x1028   :  { %vm1560_vm7 = vcmp.eq.s32.totalorder %v1559_v10, 1 }
0x1029   :  { %v1553_v11 = vpop.permute.xlu1 %1552  ;;  %v1561_v18 = vsel %vm1560_vm7, %v1549_v54, %v1537_v46 }
0x102a   :  { %v1555_v13 = vmul.f32 %v2676_v39, %v1553_v11  ;;  %1563 = vrot.lane.b32.xlu1 %v1561_v18, %s2832_s0 }
0x102b   :  { %v1570_v14 = vpop.permute.xlu0 %1569 }
0x102c   :  { %v1572_v16 = vsel %vm1560_vm7, %v1555_v13, %v1570_v14  ;;  %v2118_v14 = vld [vmem:[#allocation9] sm:$0xff] }
0x102d   :  { %1574 = vrot.lane.b32.xlu0 %v1572_v16, %s2829_s3 }
0x1090   :  { %v1709_v17 = vpop.permute.xlu1 %1708 }
0x1091   :  { %1711 = vst.msk [vmem:[#allocation4] sm:$0xff] %vm86_vm0, %v1709_v17 }
0x1094   :  { %v1698_v19 = vpop.permute.xlu1 %1697 }
0x1095   :  { %1700 = vst.msk [vmem:[#allocation5] sm:$0xff] %vm86_vm0, %v1698_v19 }
0x1098   :  { %v1852_v20 = vld [vmem:[#allocation4] sm:$0xff] }
0x1099   :  { %2546 = vmatmul.mubr.msk.f32.vlgmr.msra.gmra.mxu1 %vm86_vm0, %v1852_v20 }
0x109a   :  { %2560 = vmatpush3.msra.mxu1 %v3167_v51  ;;  %2567 = vmatprep.mubr.msk.f32.mxu1 %vm2828_vm1, %v2827_v0 }
0x109b   :  { %2561 = vmatprep.subr.mxu1 %v2827_v0 }
0x109c   :  { %v1564_v21 = vpop.permute.xlu1 %1563  ;;  %v1938_v22 = vld [vmem:[#allocation5] sm:$0xff]  ;;  %2562 = vmatpush3.msra.mxu1 %v3169_v52 }
0x109d   :  { %1566 = vst.msk [vmem:[#allocation3] sm:$0xff] %vm86_vm0, %v1564_v21  ;;  %1940 = vrot.lane.b32.xlu1 %v1938_v22, %s2829_s3  ;;  %2563 = vmatprep.subr.mxu1 %v2827_v0 }
0x109e   :  { %2564 = vmatpush3.msra.mxu1 %v3175_v53 }
0x109f   :  { %v1575_v1 = vpop.permute.xlu0 %1574  ;;  %2565 = vmatprep.subr.mxu1 %v2827_v0 }
0x10a0   :  { %1577 = vst.msk [vmem:[#allocation2] sm:$0xff] %vm86_vm0, %v1575_v1  ;;  %2566 = vmatpush3.msra.mxu1 %v3177_v2 }
0x10a4   :  { %v1804_v51 = vld [vmem:[#allocation3] sm:$0xff] }
0x10a5   :  { %1806 = vrot.lane.b32.xlu1 %v1804_v51, %s2829_s3 }
0x10a7   :  { %v1718_v24 = vld [vmem:[#allocation2] sm:$0xff] }
0x10a8   :  { %2535 = vmatmul.mubr.msk.f32.vlgmr.msra.gmra.mxu0 %vm86_vm0, %v1718_v24 }
0x10a9   :  { %1962 = vperm.xlu1 %2584, %v3039_v50   ;;  %2549 = vmatpush3.msra.mxu0 %v3184_v60  ;;  %v1849_v50 = vld [vmem:[#allocation9 + $0x8] sm:$0xff]  ;;  %v1715_v60 = vld [vmem:[#allocation6 + $0x30] sm:$0xff] }
0x10aa   :  { %2550 = vmatprep.subr.mxu0 %v2827_v0  ;;  %2556 = vmatprep.mubr.msk.f32.mxu0 %vm2828_vm1, %v2827_v0 }
0x10ab   :  { %2551 = vmatpush3.msra.mxu0 %v3186_v23 }
0x10ac   :  { %2552 = vmatprep.subr.mxu0 %v2827_v0 }
0x10ad   :  { %1973 = vrot.lane.b32.xlu1 %v1852_v20, %s2832_s0  ;;  %2553 = vmatpush3.msra.mxu0 %v3191_v12  ;;  %v1985_v20 = vld [vmem:[#allocation6 + $0x38] sm:$0xff] }
0x10ae   :  { %2554 = vmatprep.subr.mxu0 %v2827_v0 }
0x10af   :  { %2555 = vmatpush3.msra.mxu0 %v3196_v62 }
0x110f   :  { %v1941_v33 = vpop.permute.xlu1 %1940 }
0x1117   :  { %v1807_v37 = vpop.permute.xlu1 %1806 }
0x1124   :  { %v1963_v43 = vpop.permute.xlu1 %1962 }
0x1125   :  { %vm1964_vm1 = vcmp.eq.s32.totalorder %v1963_v43, 1 }
0x1128   :  { %v1974_v46 = vpop.permute.xlu1 %1973 }
0x1159   :  { %v1926_v52 = vpop.f32.mrf.mxu1 }
0x115a   :  { %v1930_v53 = vadd.f32 %v1926_v52, %v1849_v50 }
0x115b   :  { %v2547_v2 = vpop.f32.mrf.mxu1 }
0x115c   :  { %2681 = vtanh.f32 %v1930_v53  ;;  %v2309_v12 = vmul.f32 -1.442695, %v1930_v53 }
0x1168   :  { %v1792_v55 = vpop.f32.mrf.mxu0 }
0x1169   :  { %v2682_v3 = vpop.eup %2681  ;;  %v1796_v5 = vadd.f32 %v1792_v55, %v1715_v60 }
0x116a   :  { %1945 = vrot.lane.b32.xlu0 %v2682_v3, %s2831_s4  ;;  %v2536_v23 = vpop.f32.mrf.mxu0 }
0x116b   :  { %2683 = vtanh.f32 %v1796_v5  ;;  %v2307_v0 = vmul.f32 -1.442695, %v1796_v5 }
0x116c   :  { %2685 = vpow2.f32 %v2309_v12 }
0x116d   :  { %2687 = vpow2.f32 %v2307_v0 }
0x1178   :  { %v2684_v7 = vpop.eup %2683 }
0x1179   :  { %1811 = vrot.lane.b32.xlu0 %v2684_v7, %s2831_s4  ;;  %v2686_v62 = vpop.eup %2685 }
0x117a   :  { %v1934_v27 = vadd.f32 1.0, %v2686_v62  ;;  %v2688_v28 = vpop.eup %2687 }
0x117b   :  { %v1800_v29 = vadd.f32 1.0, %v2688_v28 }
0x117c   :  { %2689 = vrcp.f32 %v1934_v27 }
0x117d   :  { %2691 = vrcp.f32 %v1800_v29 }
0x1189   :  { %v2690_v4 = vpop.eup %2689 }
0x118a   :  { %v2692_v6 = vpop.eup %2691  ;;  %v1943_v34 = vmul.f32 %v2690_v4, %v1941_v33 }
0x118b   :  { %v1809_v38 = vmul.f32 %v2692_v6, %v1807_v37 }
0x11dc   :  { %v1946_v30 = vpop.permute.xlu0 %1945 }
0x11dd   :  { %v1948_v31 = vmul.f32 %v2690_v4, %v1946_v30 }
0x11df   :  { %1950 = vrot.lane.b32.xlu0 %v1948_v31, %s2829_s3 }
0x11eb   :  { %v1812_v32 = vpop.permute.xlu0 %1811 }
0x11ec   :  { %v1814_v8 = vmul.f32 %v2692_v6, %v1812_v32 }
0x11ee   :  { %1816 = vrot.lane.b32.xlu0 %v1814_v8, %s2829_s3 }
0x1251   :  { %v1951_v35 = vpop.permute.xlu0 %1950 }
0x1252   :  { %v1953_v36 = vadd.f32 %v1951_v35, %v1943_v34 }
0x1254   :  { %2693 = vtanh.f32 %v1953_v36  ;;  %v1965_v48 = vsel %vm1964_vm1, %v1953_v36, %v1941_v33 }
0x1260   :  { %v1817_v39 = vpop.permute.xlu0 %1816 }
0x1261   :  { %v2694_v40 = vpop.eup %2693  ;;  %v1819_v41 = vadd.f32 %v1817_v39, %v1809_v38 }
0x1262   :  { %1956 = vrot.lane.b32.xlu0 %v2694_v40, %s2831_s4 }
0x1263   :  { %2695 = vtanh.f32 %v1819_v41 }
0x1266   :  { %1828 = vperm.xlu0 %2583, %v3019_v15  }
0x126a   :  { %1839 = vrot.lane.b32.xlu0 %v1718_v24, %s2832_s0 }
0x1270   :  { %v2696_v42 = vpop.eup %2695 }
0x1271   :  { %1822 = vrot.lane.b32.xlu1 %v2696_v42, %s2831_s4 }
0x12d4   :  { %v1957_v44 = vpop.permute.xlu0 %1956 }
0x12d5   :  { %v1959_v45 = vmul.f32 %v2690_v4, %v1957_v44 }
0x12d7   :  { %v1976_v47 = vsel %vm1964_vm1, %v1959_v45, %v1974_v46 }
0x12d8   :  { %1978 = vrot.lane.b32.xlu1 %v1976_v47, %s2829_s3 }
0x12dc   :  { %1967 = vrot.lane.b32.xlu1 %v1965_v48, %s2832_s0 }
0x12e1   :  { %v1829_v49 = vpop.permute.xlu0 %1828 }
0x12e2   :  { %vm1830_vm8 = vcmp.eq.s32.totalorder %v1829_v49, 1 }
0x12e3   :  { %v1831_v54 = vsel %vm1830_vm8, %v1819_v41, %v1807_v37  ;;  %v1823_v15 = vpop.permute.xlu1 %1822 }
0x12e4   :  { %v1825_v56 = vmul.f32 %v2692_v6, %v1823_v15  ;;  %1833 = vrot.lane.b32.xlu1 %v1831_v54, %s2832_s0 }
0x12e5   :  { %v1840_v57 = vpop.permute.xlu0 %1839 }
0x12e6   :  { %v1842_v58 = vsel %vm1830_vm8, %v1825_v56, %v1840_v57 }
0x12e7   :  { %1844 = vrot.lane.b32.xlu0 %v1842_v58, %s2829_s3 }
0x134a   :  { %v1979_v59 = vpop.permute.xlu1 %1978 }
0x134b   :  { %1981 = vst.msk [vmem:[#allocation4] sm:$0xff] %vm86_vm0, %v1979_v59 }
0x134e   :  { %v1968_v61 = vpop.permute.xlu1 %1967 }
0x134f   :  { %1970 = vst.msk [vmem:[#allocation5] sm:$0xff] %vm86_vm0, %v1968_v61 }
0x1352   :  { %v2121_v63 = vld [vmem:[#allocation4] sm:$0xff] }
0x1353   :  { %2568 = vmatmul.mubr.msk.f32.vlgmr.msra.gmra.mxu1 %vm86_vm0, %v2121_v63 }
0x1356   :  { %v1834_v9 = vpop.permute.xlu1 %1833  ;;  %v2207_v10 = vld [vmem:[#allocation5] sm:$0xff] }
0x1357   :  { %1836 = vst.msk [vmem:[#allocation3] sm:$0xff] %vm86_vm0, %v1834_v9  ;;  %2209 = vrot.lane.b32.xlu1 %v2207_v10, %s2829_s3 }
0x1359   :  { %v1845_v11 = vpop.permute.xlu0 %1844 }
0x135a   :  { %1847 = vst.msk [vmem:[#allocation2] sm:$0xff] %vm86_vm0, %v1845_v11 }
0x135e   :  { %v2074_v18 = vld [vmem:[#allocation3] sm:$0xff] }
0x135f   :  { %2076 = vrot.lane.b32.xlu1 %v2074_v18, %s2829_s3 }
0x1361   :  { %v1988_v13 = vld [vmem:[#allocation2] sm:$0xff] }
0x1362   :  { %2557 = vmatmul.mubr.msk.f32.vlgmr.msra.gmra.mxu0 %vm86_vm0, %v1988_v13 }
0x1363   :  { %2231 = vperm.xlu1 %2584, %v2980_v26  }
0x1367   :  { %2242 = vrot.lane.b32.xlu1 %v2121_v63, %s2832_s0 }
0x13c9   :  { %v2210_v0 = vpop.permute.xlu1 %2209 }
0x13d1   :  { %v2077_v29 = vpop.permute.xlu1 %2076 }
0x13de   :  { %v2232_v8 = vpop.permute.xlu1 %2231 }
0x13df   :  { %vm2233_vm9 = vcmp.eq.s32.totalorder %v2232_v8, 1 }
0x13e2   :  { %v2243_v35 = vpop.permute.xlu1 %2242 }
0x1413   :  { %v2195_v16 = vpop.f32.mrf.mxu1 }
0x1414   :  { %v2199_v17 = vadd.f32 %v2195_v16, %v2118_v14 }
0x1415   :  { %v2569_v19 = vpop.f32.mrf.mxu1 }
0x1416   :  { %2697 = vtanh.f32 %v2199_v17  ;;  %v2313_v50 = vmul.f32 -1.442695, %v2199_v17 }
0x1422   :  { %v2062_v21 = vpop.f32.mrf.mxu0 }
0x1423   :  { %v2698_v22 = vpop.eup %2697  ;;  %v2066_v1 = vadd.f32 %v2062_v21, %v1985_v20 }
0x1424   :  { %2214 = vrot.lane.b32.xlu0 %v2698_v22, %s2831_s4  ;;  %v2558_v51 = vpop.f32.mrf.mxu0 }
0x1425   :  { %2699 = vtanh.f32 %v2066_v1  ;;  %v2311_v26 = vmul.f32 -1.442695, %v2066_v1 }
0x1426   :  { %2701 = vpow2.f32 %v2313_v50 }
0x1427   :  { %2703 = vpow2.f32 %v2311_v26 }
0x1432   :  { %v2700_v24 = vpop.eup %2699 }
0x1433   :  { %2081 = vrot.lane.b32.xlu0 %v2700_v24, %s2831_s4  ;;  %v2702_v52 = vpop.eup %2701 }
0x1434   :  { %v2203_v53 = vadd.f32 1.0, %v2702_v52  ;;  %v2704_v2 = vpop.eup %2703 }
0x1435   :  { %v2070_v60 = vadd.f32 1.0, %v2704_v2 }
0x1436   :  { %2705 = vrcp.f32 %v2203_v53 }
0x1437   :  { %2707 = vrcp.f32 %v2070_v60 }
0x1443   :  { %v2706_v55 = vpop.eup %2705 }
0x1444   :  { %v2708_v23 = vpop.eup %2707  ;;  %v2212_v62 = vmul.f32 %v2706_v55, %v2210_v0 }
0x1445   :  { %v2079_v4 = vmul.f32 %v2708_v23, %v2077_v29 }
0x1496   :  { %v2215_v3 = vpop.permute.xlu0 %2214 }
0x1497   :  { %v2217_v5 = vmul.f32 %v2706_v55, %v2215_v3 }
0x1499   :  { %2219 = vrot.lane.b32.xlu0 %v2217_v5, %s2829_s3 }
0x14a5   :  { %v2082_v7 = vpop.permute.xlu0 %2081 }
0x14a6   :  { %v2084_v12 = vmul.f32 %v2708_v23, %v2082_v7 }
0x14a8   :  { %2086 = vrot.lane.b32.xlu0 %v2084_v12, %s2829_s3 }
0x150b   :  { %v2220_v27 = vpop.permute.xlu0 %2219 }
0x150c   :  { %v2222_v28 = vadd.f32 %v2220_v27, %v2212_v62 }
0x150e   :  { %2709 = vtanh.f32 %v2222_v28  ;;  %v2234_v44 = vsel %vm2233_vm9, %v2222_v28, %v2210_v0 }
0x151a   :  { %v2087_v30 = vpop.permute.xlu0 %2086 }
0x151b   :  { %v2710_v31 = vpop.eup %2709  ;;  %v2089_v6 = vadd.f32 %v2087_v30, %v2079_v4 }
0x151c   :  { %2225 = vrot.lane.b32.xlu0 %v2710_v31, %s2831_s4 }
0x151d   :  { %2711 = vtanh.f32 %v2089_v6 }
0x1520   :  { %2098 = vperm.xlu0 %2583, %v2975_v25  }
0x1524   :  { %2109 = vrot.lane.b32.xlu0 %v1988_v13, %s2832_s0 }
0x152a   :  { %v2712_v32 = vpop.eup %2711 }
0x152b   :  { %2092 = vrot.lane.b32.xlu1 %v2712_v32, %s2831_s4 }
0x158e   :  { %v2226_v33 = vpop.permute.xlu0 %2225 }
0x158f   :  { %v2228_v34 = vmul.f32 %v2706_v55, %v2226_v33 }
0x1591   :  { %v2245_v36 = vsel %vm2233_vm9, %v2228_v34, %v2243_v35 }
0x1592   :  { %2247 = vrot.lane.b32.xlu1 %v2245_v36, %s2829_s3 }
0x159b   :  { %v2099_v37 = vpop.permute.xlu0 %2098 }
0x159c   :  { %vm2100_vm10 = vcmp.eq.s32.totalorder %v2099_v37, 1 }
0x159d   :  { %v2093_v38 = vpop.permute.xlu1 %2092  ;;  %v2101_v41 = vsel %vm2100_vm10, %v2089_v6, %v2077_v29 }
0x159e   :  { %v2095_v39 = vmul.f32 %v2708_v23, %v2093_v38 }
0x159f   :  { %v2110_v40 = vpop.permute.xlu0 %2109 }
0x15a0   :  { %v2112_v25 = vsel %vm2100_vm10, %v2095_v39, %v2110_v40 }
0x15a1   :  { %2114 = vrot.lane.b32.xlu0 %v2112_v25, %s2829_s3 }
0x15a5   :  { %2103 = vrot.lane.b32.xlu0 %v2101_v41, %s2832_s0 }
0x1604   :  { %v2248_v42 = vpop.permute.xlu1 %2247 }
0x1605   :  { %2250 = vst.msk [vmem:[#allocation4] sm:$0xff] %vm86_vm0, %v2248_v42 }
0x160c   :  { %v2255_v43 = vld [vmem:[#allocation4] sm:$0xff] }
0x160d   :  { %2257 = vrot.lane.b32.xlu1 %v2255_v43, %s2829_s3 }
0x1611   :  { %2236 = vrot.lane.b32.xlu1 %v2234_v44, %s2832_s0 }
0x1613   :  { %v2115_v45 = vpop.permute.xlu0 %2114 }
0x1614   :  { %2117 = vst.msk [vmem:[#allocation2] sm:$0xff] %vm86_vm0, %v2115_v45 }
0x1617   :  { %v2104_v46 = vpop.permute.xlu0 %2103 }
0x1618   :  { %2106 = vst.msk [vmem:[#allocation3] sm:$0xff] %vm86_vm0, %v2104_v46 }
0x161b   :  { %v2254_v47 = vld [vmem:[#allocation2] sm:$0xff] }
0x167f   :  { %v2258_v48 = vpop.permute.xlu1 %2257 }
0x1680   :  { %v2260_v49 = vsel %vm86_vm0, %v2254_v47, %v2258_v48 }
0x1681   :  { %2262 = vst.msk [vmem:[#allocation14] sm:$0xff] %vm2261_vm11, %v2260_v49 }
0x1682   :  { %2804 = shalt.err (!%p2801_p10)
}
0x1683   :  { %2272 = dma.vmem_to_hbm [thread:$0]  %s2270_s16, 128, %s3323_s5, [#allocation8]   ;;  %v2237_v54 = vpop.permute.xlu1 %2236 }
0x1684   :  { %2239 = vst.msk [vmem:[#allocation5] sm:$0xff] %vm86_vm0, %v2237_v54 }
0x1685   :  { %2819 = dma.done.wait [#allocation8], 128  }
0x1686   :  { %2820 = vsyncadd [#allocation8], 4294967168 }
0x1687   :  { %2276 = vsyncpa [#allocation7], 1 }
0x1688   :  { %2277 = vsyncpa [#allocation10], 1 }
0x1689   :  { %2278 = vsyncpa [#allocation13], 1 }
0x168a   :  { %2279 = vsyncpa [#allocation8], 1 }

</bundles_post_ra>
